<compile_context>
chip_gen: v5e
topology: v5e:2x2
jax: 0.10.0
libtpu: 0.0.40
codegen_flags: <defaults>
</compile_context>

<pallas_src>
import jax
import jax.numpy as jnp
from jax.experimental import pallas as pl
from jax.experimental.pallas import tpu as pltpu


# -----------------------------------------------------------------------------
# Fused Pallas kernel (built per static config: seq_len, hidden_sizes)
# -----------------------------------------------------------------------------
def build_fused_mylstm_kernel(seq_len, hidden_sizes):
    num_layers = len(hidden_sizes)

    def kernel(*refs):
        # refs = (x, [wx, wh, b, whh, bh] * L, wo, bo, out)
        x_ref = refs[0]
        layer_refs = refs[1:1 + 5 * num_layers]
        wo_ref, bo_ref, out_ref = refs[1 + 5 * num_layers:]

        h_seq = x_ref[...]                      # (T, I0), lives in vregs
        h_last = None

        for l in range(num_layers):
            wx_ref, wh_ref, b_ref, whh_ref, bh_ref = layer_refs[5 * l:5 * l + 5]
            H = hidden_sizes[l]
            wx = wx_ref[...]                    # (I_l, 3H)  [Wfx|Wix|Wcx]
            wh = wh_ref[...]                    # (H, 3H)    [Wfh|Wih|Wch]
            b = b_ref[...]                      # (1, 3H)    [bf |bi |bc ]
            whh = whh_ref[...]                  # (H, H)
            bh = bh_ref[...]                    # (1, H)

            # Hoisted: x-side projection for ALL timesteps in one wide matmul.
            gates_x = jnp.dot(h_seq, wx,
                              preferred_element_type=jnp.float32) + b   # (T, 3H)

            h = jnp.zeros((1, H), jnp.float32)
            c = jnp.zeros((1, H), jnp.float32)
            outs = []
            # Fully unrolled static time loop (T is small and static).
            for t in range(seq_len):
                g = gates_x[t:t + 1, :] + jnp.dot(
                    h, wh, preferred_element_type=jnp.float32)           # (1, 3H)
                f = jax.nn.sigmoid(g[:, 0:H])
                i = jax.nn.sigmoid(g[:, H:2 * H])
                c_new = jnp.tanh(g[:, 2 * H:3 * H])
                c = f * c + i * c_new
                # MyLSTMLayer: hidden = relu(hidden_value_gate(cell_state))
                h = jnp.maximum(
                    jnp.dot(c, whh, preferred_element_type=jnp.float32) + bh,
                    0.0)
                outs.append(h)

            if l + 1 < num_layers:
                # Next layer consumes the full hidden sequence (stays on-chip).
                h_seq = jnp.concatenate(outs, axis=0)                    # (T, H)
            h_last = h                          # hiddens[-1] of the last layer

        # outputGate Linear + LogSoftmax (dim=1), written once (lane-dense).
        logits = jnp.dot(h_last, wo_ref[...],
                         preferred_element_type=jnp.float32) + bo_ref[...]
        m = jnp.max(logits, axis=-1, keepdims=True)
        z = logits - m
        out_ref[...] = z - jnp.log(jnp.sum(jnp.exp(z), axis=-1, keepdims=True))

    return kernel


# -----------------------------------------------------------------------------
# Wrapper
# -----------------------------------------------------------------------------
@jax.jit
def my_lstm_forward(x_t1f, layer_params, out_w, out_b):
    """Full MyLSTM forward. x_t1f: (T, 1, F) time-major, batch==1."""
    seq_len = x_t1f.shape[0]
    hidden_sizes = [int(p["whh"].shape[1]) for p in layer_params]
    output_size = out_w.shape[1]

    x = x_t1f[:, 0, :]                          # (T, F)
    flat_params = []
    for p in layer_params:
        flat_params += [p["wx"], p["wh"], p["b"], p["whh"], p["bh"]]

    kernel = build_fused_mylstm_kernel(seq_len, hidden_sizes)
    vmem = pl.BlockSpec(memory_space=pltpu.MemorySpace.VMEM)
    n_inputs = 1 + len(flat_params) + 2

    return pl.pallas_call(
        kernel,
        out_shape=jax.ShapeDtypeStruct((1, output_size), jnp.float32),
        in_specs=[vmem] * n_inputs,
        out_specs=vmem,
    )(x, *flat_params, out_w, out_b)


# -----------------------------------------------------------------------------
# Deterministic parameter init (PyTorch nn.Linear-style uniform, synthetic),
# packed host-side into the gate slabs the kernel expects.
# -----------------------------------------------------------------------------
def init_linear(key, in_dim, out_dim):
    k_w, k_b = jax.random.split(key)
    bound = 1.0 / jnp.sqrt(jnp.float32(in_dim))
    w = jax.random.uniform(k_w, (out_dim, in_dim), jnp.float32, -bound, bound)
    b = jax.random.uniform(k_b, (out_dim,), jnp.float32, -bound, bound)
    return w, b


def init_my_lstm_params(key, net_input_size, hidden_sizes, output_size):
    input_sizes = [net_input_size] + hidden_sizes[:-1]
    layer_params = []
    for in_sz, hid_sz in zip(input_sizes, hidden_sizes):
        key, kf, ki, kc, kh = jax.random.split(key, 5)
        wf, bf = init_linear(kf, in_sz + hid_sz, hid_sz)
        wi, bi = init_linear(ki, in_sz + hid_sz, hid_sz)
        wc, bc = init_linear(kc, in_sz + hid_sz, hid_sz)
        wh, bh = init_linear(kh, hid_sz, hid_sz)
        wfT, wiT, wcT = wf.T, wi.T, wc.T        # (in+hid, hid), y = x @ W
        # Split the cat([x, h]) weights and pack the three gates lane-wise.
        wx_all = jnp.concatenate([wfT[:in_sz], wiT[:in_sz], wcT[:in_sz]], axis=1)
        wh_all = jnp.concatenate([wfT[in_sz:], wiT[in_sz:], wcT[in_sz:]], axis=1)
        b_all = jnp.concatenate([bf, bi, bc])[None, :]
        layer_params.append(dict(
            wx=wx_all,              # (in, 3H)
            wh=wh_all,              # (H, 3H)
            b=b_all,                # (1, 3H)
            whh=wh.T,               # (H, H)
            bh=bh[None, :],         # (1, H)
        ))
    key, ko = jax.random.split(key)
    wo, bo = init_linear(ko, hidden_sizes[-1], output_size)
    return layer_params, wo.T, bo[None, :]


# -----------------------------------------------------------------------------
# Pure-JAX reference (mirrors the PyTorch forward) for a correctness check
# -----------------------------------------------------------------------------
def reference_forward(x_t1f, layer_params, out_w, out_b):
    hiddens = x_t1f[:, 0, :]
    for p in layer_params:
        seq = hiddens.shape[0]
        H = p["whh"].shape[1]
        h = jnp.zeros((1, H), jnp.float32)
        c = jnp.zeros((1, H), jnp.float32)
        outs = []
        for t in range(seq):
            x_t = hiddens[t:t + 1]
            g = x_t @ p["wx"] + h @ p["wh"] + p["b"]
            f = jax.nn.sigmoid(g[:, 0:H])
            i = jax.nn.sigmoid(g[:, H:2 * H])
            c_new = jnp.tanh(g[:, 2 * H:3 * H])
            c = f * c + i * c_new
            h = jnp.maximum(c @ p["whh"] + p["bh"], 0.0)
            outs.append(h)
        hiddens = jnp.concatenate(outs, axis=0)
    logits = hiddens[-1:, :] @ out_w + out_b
    return jax.nn.log_softmax(logits, axis=-1)


if __name__ == "__main__":
    # Shapes consistent with the module: seq=8, batch=1 (forced by the module),
    # net_input_size=16, hidden_sizes=[32, 32] (layers=2), output_size=10.
    seq_len = 8
    net_input_size = 16
    hidden_sizes = [32, 32]
    output_size = 10

    key = jax.random.PRNGKey(0)
    key, k_x, k_p = jax.random.split(key, 3)
    x = jax.random.normal(k_x, (seq_len, 1, net_input_size), jnp.float32)
    layer_params, out_w, out_b = init_my_lstm_params(
        k_p, net_input_size, hidden_sizes, output_size)

    out = my_lstm_forward(x, layer_params, out_w, out_b)
    out = jax.block_until_ready(out)

    ref = reference_forward(x, layer_params, out_w, out_b)
    assert out.shape == (1, output_size)
    assert jnp.allclose(out, ref, rtol=1e-4, atol=1e-4), (out, ref)

    print("KERNEL_OK")
</pallas_src>

<mosaic_0001>
module attributes {stable_mosaic.version = 11 : i64} {
  func.func @kernel(%arg0: memref<8x16xf32, #tpu.memory_space<vmem>>, %arg1: memref<16x96xf32, #tpu.memory_space<vmem>>, %arg2: memref<32x96xf32, #tpu.memory_space<vmem>>, %arg3: memref<1x96xf32, #tpu.memory_space<vmem>>, %arg4: memref<32x32xf32, #tpu.memory_space<vmem>>, %arg5: memref<1x32xf32, #tpu.memory_space<vmem>>, %arg6: memref<32x96xf32, #tpu.memory_space<vmem>>, %arg7: memref<32x96xf32, #tpu.memory_space<vmem>>, %arg8: memref<1x96xf32, #tpu.memory_space<vmem>>, %arg9: memref<32x32xf32, #tpu.memory_space<vmem>>, %arg10: memref<1x32xf32, #tpu.memory_space<vmem>>, %arg11: memref<32x10xf32, #tpu.memory_space<vmem>>, %arg12: memref<1x10xf32, #tpu.memory_space<vmem>>, %arg13: memref<1x10xf32, #tpu.memory_space<vmem>>) attributes {dimension_semantics = [], scalar_prefetch = 0 : i64, scratch_operands = 0 : i64, tpu.core_type = #tpu.core_type<tc>} {
    %c0 = arith.constant 0 : index
    %c0_0 = arith.constant 0 : index
    %0 = vector.load %arg0[%c0, %c0_0] : memref<8x16xf32, #tpu.memory_space<vmem>>, vector<8x16xf32>
    %c0_1 = arith.constant 0 : index
    %c0_2 = arith.constant 0 : index
    %1 = vector.load %arg1[%c0_1, %c0_2] : memref<16x96xf32, #tpu.memory_space<vmem>>, vector<16x96xf32>
    %c0_3 = arith.constant 0 : index
    %c0_4 = arith.constant 0 : index
    %2 = vector.load %arg2[%c0_3, %c0_4] : memref<32x96xf32, #tpu.memory_space<vmem>>, vector<32x96xf32>
    %c0_5 = arith.constant 0 : index
    %c0_6 = arith.constant 0 : index
    %3 = vector.load %arg3[%c0_5, %c0_6] : memref<1x96xf32, #tpu.memory_space<vmem>>, vector<1x96xf32>
    %c0_7 = arith.constant 0 : index
    %c0_8 = arith.constant 0 : index
    %4 = vector.load %arg4[%c0_7, %c0_8] : memref<32x32xf32, #tpu.memory_space<vmem>>, vector<32x32xf32>
    %c0_9 = arith.constant 0 : index
    %c0_10 = arith.constant 0 : index
    %5 = vector.load %arg5[%c0_9, %c0_10] : memref<1x32xf32, #tpu.memory_space<vmem>>, vector<1x32xf32>
    %cst = arith.constant dense<0.000000e+00> : vector<8x96xf32>
    %6 = tpu.matmul %0, %1, %cst {dimension_numbers = #tpu.dot_dimension_numbers<[1], [0], [0], [1], [0, 0, 1, 1], [], []>} : vector<8x16xf32>, vector<16x96xf32>, vector<8x96xf32> -> vector<8x96xf32>
    %7 = vector.broadcast %3 : vector<1x96xf32> to vector<8x96xf32>
    %8 = arith.addf %6, %7 : vector<8x96xf32>
    %cst_11 = arith.constant 0.000000e+00 : f32
    %9 = vector.broadcast %cst_11 : f32 to vector<1x32xf32>
    %cst_12 = arith.constant 0.000000e+00 : f32
    %10 = vector.broadcast %cst_12 : f32 to vector<1x32xf32>
    %11 = vector.extract_strided_slice %8 {offsets = [0, 0], sizes = [1, 96], strides = [1, 1]} : vector<8x96xf32> to vector<1x96xf32>
    %cst_13 = arith.constant dense<0.000000e+00> : vector<1x96xf32>
    %12 = tpu.matmul %9, %2, %cst_13 {dimension_numbers = #tpu.dot_dimension_numbers<[1], [0], [0], [1], [0, 0, 1, 1], [], []>} : vector<1x32xf32>, vector<32x96xf32>, vector<1x96xf32> -> vector<1x96xf32>
    %13 = arith.addf %11, %12 : vector<1x96xf32>
    %14 = vector.extract_strided_slice %13 {offsets = [0, 0], sizes = [1, 32], strides = [1, 1]} : vector<1x96xf32> to vector<1x32xf32>
    %15 = arith.negf %14 : vector<1x32xf32>
    %16 = math.exp %15 : vector<1x32xf32>
    %cst_14 = arith.constant 1.000000e+00 : f32
    %17 = vector.broadcast %cst_14 : f32 to vector<1x32xf32>
    %18 = arith.addf %17, %16 : vector<1x32xf32>
    %19 = arith.divf %17, %18 : vector<1x32xf32>
    %20 = vector.extract_strided_slice %13 {offsets = [0, 32], sizes = [1, 32], strides = [1, 1]} : vector<1x96xf32> to vector<1x32xf32>
    %21 = arith.negf %20 : vector<1x32xf32>
    %22 = math.exp %21 : vector<1x32xf32>
    %cst_15 = arith.constant 1.000000e+00 : f32
    %23 = vector.broadcast %cst_15 : f32 to vector<1x32xf32>
    %24 = arith.addf %23, %22 : vector<1x32xf32>
    %25 = arith.divf %23, %24 : vector<1x32xf32>
    %26 = vector.extract_strided_slice %13 {offsets = [0, 64], sizes = [1, 32], strides = [1, 1]} : vector<1x96xf32> to vector<1x32xf32>
    %27 = math.tanh %26 : vector<1x32xf32>
    %28 = arith.mulf %19, %10 : vector<1x32xf32>
    %29 = arith.mulf %25, %27 : vector<1x32xf32>
    %30 = arith.addf %28, %29 : vector<1x32xf32>
    %cst_16 = arith.constant dense<0.000000e+00> : vector<1x32xf32>
    %31 = tpu.matmul %30, %4, %cst_16 {dimension_numbers = #tpu.dot_dimension_numbers<[1], [0], [0], [1], [0, 0, 1, 1], [], []>} : vector<1x32xf32>, vector<32x32xf32>, vector<1x32xf32> -> vector<1x32xf32>
    %32 = arith.addf %31, %5 : vector<1x32xf32>
    %cst_17 = arith.constant 0.000000e+00 : f32
    %33 = vector.broadcast %cst_17 : f32 to vector<1x32xf32>
    %34 = arith.maximumf %32, %33 : vector<1x32xf32>
    %35 = vector.extract_strided_slice %8 {offsets = [1, 0], sizes = [1, 96], strides = [1, 1]} : vector<8x96xf32> to vector<1x96xf32>
    %cst_18 = arith.constant dense<0.000000e+00> : vector<1x96xf32>
    %36 = tpu.matmul %34, %2, %cst_18 {dimension_numbers = #tpu.dot_dimension_numbers<[1], [0], [0], [1], [0, 0, 1, 1], [], []>} : vector<1x32xf32>, vector<32x96xf32>, vector<1x96xf32> -> vector<1x96xf32>
    %37 = arith.addf %35, %36 : vector<1x96xf32>
    %38 = vector.extract_strided_slice %37 {offsets = [0, 0], sizes = [1, 32], strides = [1, 1]} : vector<1x96xf32> to vector<1x32xf32>
    %39 = arith.negf %38 : vector<1x32xf32>
    %40 = math.exp %39 : vector<1x32xf32>
    %cst_19 = arith.constant 1.000000e+00 : f32
    %41 = vector.broadcast %cst_19 : f32 to vector<1x32xf32>
    %42 = arith.addf %41, %40 : vector<1x32xf32>
    %43 = arith.divf %41, %42 : vector<1x32xf32>
    %44 = vector.extract_strided_slice %37 {offsets = [0, 32], sizes = [1, 32], strides = [1, 1]} : vector<1x96xf32> to vector<1x32xf32>
    %45 = arith.negf %44 : vector<1x32xf32>
    %46 = math.exp %45 : vector<1x32xf32>
    %cst_20 = arith.constant 1.000000e+00 : f32
    %47 = vector.broadcast %cst_20 : f32 to vector<1x32xf32>
    %48 = arith.addf %47, %46 : vector<1x32xf32>
    %49 = arith.divf %47, %48 : vector<1x32xf32>
    %50 = vector.extract_strided_slice %37 {offsets = [0, 64], sizes = [1, 32], strides = [1, 1]} : vector<1x96xf32> to vector<1x32xf32>
    %51 = math.tanh %50 : vector<1x32xf32>
    %52 = arith.mulf %43, %30 : vector<1x32xf32>
    %53 = arith.mulf %49, %51 : vector<1x32xf32>
    %54 = arith.addf %52, %53 : vector<1x32xf32>
    %cst_21 = arith.constant dense<0.000000e+00> : vector<1x32xf32>
    %55 = tpu.matmul %54, %4, %cst_21 {dimension_numbers = #tpu.dot_dimension_numbers<[1], [0], [0], [1], [0, 0, 1, 1], [], []>} : vector<1x32xf32>, vector<32x32xf32>, vector<1x32xf32> -> vector<1x32xf32>
    %56 = arith.addf %55, %5 : vector<1x32xf32>
    %cst_22 = arith.constant 0.000000e+00 : f32
    %57 = vector.broadcast %cst_22 : f32 to vector<1x32xf32>
    %58 = arith.maximumf %56, %57 : vector<1x32xf32>
    %59 = vector.extract_strided_slice %8 {offsets = [2, 0], sizes = [1, 96], strides = [1, 1]} : vector<8x96xf32> to vector<1x96xf32>
    %cst_23 = arith.constant dense<0.000000e+00> : vector<1x96xf32>
    %60 = tpu.matmul %58, %2, %cst_23 {dimension_numbers = #tpu.dot_dimension_numbers<[1], [0], [0], [1], [0, 0, 1, 1], [], []>} : vector<1x32xf32>, vector<32x96xf32>, vector<1x96xf32> -> vector<1x96xf32>
    %61 = arith.addf %59, %60 : vector<1x96xf32>
    %62 = vector.extract_strided_slice %61 {offsets = [0, 0], sizes = [1, 32], strides = [1, 1]} : vector<1x96xf32> to vector<1x32xf32>
    %63 = arith.negf %62 : vector<1x32xf32>
    %64 = math.exp %63 : vector<1x32xf32>
    %cst_24 = arith.constant 1.000000e+00 : f32
    %65 = vector.broadcast %cst_24 : f32 to vector<1x32xf32>
    %66 = arith.addf %65, %64 : vector<1x32xf32>
    %67 = arith.divf %65, %66 : vector<1x32xf32>
    %68 = vector.extract_strided_slice %61 {offsets = [0, 32], sizes = [1, 32], strides = [1, 1]} : vector<1x96xf32> to vector<1x32xf32>
    %69 = arith.negf %68 : vector<1x32xf32>
    %70 = math.exp %69 : vector<1x32xf32>
    %cst_25 = arith.constant 1.000000e+00 : f32
    %71 = vector.broadcast %cst_25 : f32 to vector<1x32xf32>
    %72 = arith.addf %71, %70 : vector<1x32xf32>
    %73 = arith.divf %71, %72 : vector<1x32xf32>
    %74 = vector.extract_strided_slice %61 {offsets = [0, 64], sizes = [1, 32], strides = [1, 1]} : vector<1x96xf32> to vector<1x32xf32>
    %75 = math.tanh %74 : vector<1x32xf32>
    %76 = arith.mulf %67, %54 : vector<1x32xf32>
    %77 = arith.mulf %73, %75 : vector<1x32xf32>
    %78 = arith.addf %76, %77 : vector<1x32xf32>
    %cst_26 = arith.constant dense<0.000000e+00> : vector<1x32xf32>
    %79 = tpu.matmul %78, %4, %cst_26 {dimension_numbers = #tpu.dot_dimension_numbers<[1], [0], [0], [1], [0, 0, 1, 1], [], []>} : vector<1x32xf32>, vector<32x32xf32>, vector<1x32xf32> -> vector<1x32xf32>
    %80 = arith.addf %79, %5 : vector<1x32xf32>
    %cst_27 = arith.constant 0.000000e+00 : f32
    %81 = vector.broadcast %cst_27 : f32 to vector<1x32xf32>
    %82 = arith.maximumf %80, %81 : vector<1x32xf32>
    %83 = vector.extract_strided_slice %8 {offsets = [3, 0], sizes = [1, 96], strides = [1, 1]} : vector<8x96xf32> to vector<1x96xf32>
    %cst_28 = arith.constant dense<0.000000e+00> : vector<1x96xf32>
    %84 = tpu.matmul %82, %2, %cst_28 {dimension_numbers = #tpu.dot_dimension_numbers<[1], [0], [0], [1], [0, 0, 1, 1], [], []>} : vector<1x32xf32>, vector<32x96xf32>, vector<1x96xf32> -> vector<1x96xf32>
    %85 = arith.addf %83, %84 : vector<1x96xf32>
    %86 = vector.extract_strided_slice %85 {offsets = [0, 0], sizes = [1, 32], strides = [1, 1]} : vector<1x96xf32> to vector<1x32xf32>
    %87 = arith.negf %86 : vector<1x32xf32>
    %88 = math.exp %87 : vector<1x32xf32>
    %cst_29 = arith.constant 1.000000e+00 : f32
    %89 = vector.broadcast %cst_29 : f32 to vector<1x32xf32>
    %90 = arith.addf %89, %88 : vector<1x32xf32>
    %91 = arith.divf %89, %90 : vector<1x32xf32>
    %92 = vector.extract_strided_slice %85 {offsets = [0, 32], sizes = [1, 32], strides = [1, 1]} : vector<1x96xf32> to vector<1x32xf32>
    %93 = arith.negf %92 : vector<1x32xf32>
    %94 = math.exp %93 : vector<1x32xf32>
    %cst_30 = arith.constant 1.000000e+00 : f32
    %95 = vector.broadcast %cst_30 : f32 to vector<1x32xf32>
    %96 = arith.addf %95, %94 : vector<1x32xf32>
    %97 = arith.divf %95, %96 : vector<1x32xf32>
    %98 = vector.extract_strided_slice %85 {offsets = [0, 64], sizes = [1, 32], strides = [1, 1]} : vector<1x96xf32> to vector<1x32xf32>
    %99 = math.tanh %98 : vector<1x32xf32>
    %100 = arith.mulf %91, %78 : vector<1x32xf32>
    %101 = arith.mulf %97, %99 : vector<1x32xf32>
    %102 = arith.addf %100, %101 : vector<1x32xf32>
    %cst_31 = arith.constant dense<0.000000e+00> : vector<1x32xf32>
    %103 = tpu.matmul %102, %4, %cst_31 {dimension_numbers = #tpu.dot_dimension_numbers<[1], [0], [0], [1], [0, 0, 1, 1], [], []>} : vector<1x32xf32>, vector<32x32xf32>, vector<1x32xf32> -> vector<1x32xf32>
    %104 = arith.addf %103, %5 : vector<1x32xf32>
    %cst_32 = arith.constant 0.000000e+00 : f32
    %105 = vector.broadcast %cst_32 : f32 to vector<1x32xf32>
    %106 = arith.maximumf %104, %105 : vector<1x32xf32>
    %107 = vector.extract_strided_slice %8 {offsets = [4, 0], sizes = [1, 96], strides = [1, 1]} : vector<8x96xf32> to vector<1x96xf32>
    %cst_33 = arith.constant dense<0.000000e+00> : vector<1x96xf32>
    %108 = tpu.matmul %106, %2, %cst_33 {dimension_numbers = #tpu.dot_dimension_numbers<[1], [0], [0], [1], [0, 0, 1, 1], [], []>} : vector<1x32xf32>, vector<32x96xf32>, vector<1x96xf32> -> vector<1x96xf32>
    %109 = arith.addf %107, %108 : vector<1x96xf32>
    %110 = vector.extract_strided_slice %109 {offsets = [0, 0], sizes = [1, 32], strides = [1, 1]} : vector<1x96xf32> to vector<1x32xf32>
    %111 = arith.negf %110 : vector<1x32xf32>
    %112 = math.exp %111 : vector<1x32xf32>
    %cst_34 = arith.constant 1.000000e+00 : f32
    %113 = vector.broadcast %cst_34 : f32 to vector<1x32xf32>
    %114 = arith.addf %113, %112 : vector<1x32xf32>
    %115 = arith.divf %113, %114 : vector<1x32xf32>
    %116 = vector.extract_strided_slice %109 {offsets = [0, 32], sizes = [1, 32], strides = [1, 1]} : vector<1x96xf32> to vector<1x32xf32>
    %117 = arith.negf %116 : vector<1x32xf32>
    %118 = math.exp %117 : vector<1x32xf32>
    %cst_35 = arith.constant 1.000000e+00 : f32
    %119 = vector.broadcast %cst_35 : f32 to vector<1x32xf32>
    %120 = arith.addf %119, %118 : vector<1x32xf32>
    %121 = arith.divf %119, %120 : vector<1x32xf32>
    %122 = vector.extract_strided_slice %109 {offsets = [0, 64], sizes = [1, 32], strides = [1, 1]} : vector<1x96xf32> to vector<1x32xf32>
    %123 = math.tanh %122 : vector<1x32xf32>
    %124 = arith.mulf %115, %102 : vector<1x32xf32>
    %125 = arith.mulf %121, %123 : vector<1x32xf32>
    %126 = arith.addf %124, %125 : vector<1x32xf32>
    %cst_36 = arith.constant dense<0.000000e+00> : vector<1x32xf32>
    %127 = tpu.matmul %126, %4, %cst_36 {dimension_numbers = #tpu.dot_dimension_numbers<[1], [0], [0], [1], [0, 0, 1, 1], [], []>} : vector<1x32xf32>, vector<32x32xf32>, vector<1x32xf32> -> vector<1x32xf32>
    %128 = arith.addf %127, %5 : vector<1x32xf32>
    %cst_37 = arith.constant 0.000000e+00 : f32
    %129 = vector.broadcast %cst_37 : f32 to vector<1x32xf32>
    %130 = arith.maximumf %128, %129 : vector<1x32xf32>
    %131 = vector.extract_strided_slice %8 {offsets = [5, 0], sizes = [1, 96], strides = [1, 1]} : vector<8x96xf32> to vector<1x96xf32>
    %cst_38 = arith.constant dense<0.000000e+00> : vector<1x96xf32>
    %132 = tpu.matmul %130, %2, %cst_38 {dimension_numbers = #tpu.dot_dimension_numbers<[1], [0], [0], [1], [0, 0, 1, 1], [], []>} : vector<1x32xf32>, vector<32x96xf32>, vector<1x96xf32> -> vector<1x96xf32>
    %133 = arith.addf %131, %132 : vector<1x96xf32>
    %134 = vector.extract_strided_slice %133 {offsets = [0, 0], sizes = [1, 32], strides = [1, 1]} : vector<1x96xf32> to vector<1x32xf32>
    %135 = arith.negf %134 : vector<1x32xf32>
    %136 = math.exp %135 : vector<1x32xf32>
    %cst_39 = arith.constant 1.000000e+00 : f32
    %137 = vector.broadcast %cst_39 : f32 to vector<1x32xf32>
    %138 = arith.addf %137, %136 : vector<1x32xf32>
    %139 = arith.divf %137, %138 : vector<1x32xf32>
    %140 = vector.extract_strided_slice %133 {offsets = [0, 32], sizes = [1, 32], strides = [1, 1]} : vector<1x96xf32> to vector<1x32xf32>
    %141 = arith.negf %140 : vector<1x32xf32>
    %142 = math.exp %141 : vector<1x32xf32>
    %cst_40 = arith.constant 1.000000e+00 : f32
    %143 = vector.broadcast %cst_40 : f32 to vector<1x32xf32>
    %144 = arith.addf %143, %142 : vector<1x32xf32>
    %145 = arith.divf %143, %144 : vector<1x32xf32>
    %146 = vector.extract_strided_slice %133 {offsets = [0, 64], sizes = [1, 32], strides = [1, 1]} : vector<1x96xf32> to vector<1x32xf32>
    %147 = math.tanh %146 : vector<1x32xf32>
    %148 = arith.mulf %139, %126 : vector<1x32xf32>
    %149 = arith.mulf %145, %147 : vector<1x32xf32>
    %150 = arith.addf %148, %149 : vector<1x32xf32>
    %cst_41 = arith.constant dense<0.000000e+00> : vector<1x32xf32>
    %151 = tpu.matmul %150, %4, %cst_41 {dimension_numbers = #tpu.dot_dimension_numbers<[1], [0], [0], [1], [0, 0, 1, 1], [], []>} : vector<1x32xf32>, vector<32x32xf32>, vector<1x32xf32> -> vector<1x32xf32>
    %152 = arith.addf %151, %5 : vector<1x32xf32>
    %cst_42 = arith.constant 0.000000e+00 : f32
    %153 = vector.broadcast %cst_42 : f32 to vector<1x32xf32>
    %154 = arith.maximumf %152, %153 : vector<1x32xf32>
    %155 = vector.extract_strided_slice %8 {offsets = [6, 0], sizes = [1, 96], strides = [1, 1]} : vector<8x96xf32> to vector<1x96xf32>
    %cst_43 = arith.constant dense<0.000000e+00> : vector<1x96xf32>
    %156 = tpu.matmul %154, %2, %cst_43 {dimension_numbers = #tpu.dot_dimension_numbers<[1], [0], [0], [1], [0, 0, 1, 1], [], []>} : vector<1x32xf32>, vector<32x96xf32>, vector<1x96xf32> -> vector<1x96xf32>
    %157 = arith.addf %155, %156 : vector<1x96xf32>
    %158 = vector.extract_strided_slice %157 {offsets = [0, 0], sizes = [1, 32], strides = [1, 1]} : vector<1x96xf32> to vector<1x32xf32>
    %159 = arith.negf %158 : vector<1x32xf32>
    %160 = math.exp %159 : vector<1x32xf32>
    %cst_44 = arith.constant 1.000000e+00 : f32
    %161 = vector.broadcast %cst_44 : f32 to vector<1x32xf32>
    %162 = arith.addf %161, %160 : vector<1x32xf32>
    %163 = arith.divf %161, %162 : vector<1x32xf32>
    %164 = vector.extract_strided_slice %157 {offsets = [0, 32], sizes = [1, 32], strides = [1, 1]} : vector<1x96xf32> to vector<1x32xf32>
    %165 = arith.negf %164 : vector<1x32xf32>
    %166 = math.exp %165 : vector<1x32xf32>
    %cst_45 = arith.constant 1.000000e+00 : f32
    %167 = vector.broadcast %cst_45 : f32 to vector<1x32xf32>
    %168 = arith.addf %167, %166 : vector<1x32xf32>
    %169 = arith.divf %167, %168 : vector<1x32xf32>
    %170 = vector.extract_strided_slice %157 {offsets = [0, 64], sizes = [1, 32], strides = [1, 1]} : vector<1x96xf32> to vector<1x32xf32>
    %171 = math.tanh %170 : vector<1x32xf32>
    %172 = arith.mulf %163, %150 : vector<1x32xf32>
    %173 = arith.mulf %169, %171 : vector<1x32xf32>
    %174 = arith.addf %172, %173 : vector<1x32xf32>
    %cst_46 = arith.constant dense<0.000000e+00> : vector<1x32xf32>
    %175 = tpu.matmul %174, %4, %cst_46 {dimension_numbers = #tpu.dot_dimension_numbers<[1], [0], [0], [1], [0, 0, 1, 1], [], []>} : vector<1x32xf32>, vector<32x32xf32>, vector<1x32xf32> -> vector<1x32xf32>
    %176 = arith.addf %175, %5 : vector<1x32xf32>
    %cst_47 = arith.constant 0.000000e+00 : f32
    %177 = vector.broadcast %cst_47 : f32 to vector<1x32xf32>
    %178 = arith.maximumf %176, %177 : vector<1x32xf32>
    %179 = vector.extract_strided_slice %8 {offsets = [7, 0], sizes = [1, 96], strides = [1, 1]} : vector<8x96xf32> to vector<1x96xf32>
    %cst_48 = arith.constant dense<0.000000e+00> : vector<1x96xf32>
    %180 = tpu.matmul %178, %2, %cst_48 {dimension_numbers = #tpu.dot_dimension_numbers<[1], [0], [0], [1], [0, 0, 1, 1], [], []>} : vector<1x32xf32>, vector<32x96xf32>, vector<1x96xf32> -> vector<1x96xf32>
    %181 = arith.addf %179, %180 : vector<1x96xf32>
    %182 = vector.extract_strided_slice %181 {offsets = [0, 0], sizes = [1, 32], strides = [1, 1]} : vector<1x96xf32> to vector<1x32xf32>
    %183 = arith.negf %182 : vector<1x32xf32>
    %184 = math.exp %183 : vector<1x32xf32>
    %cst_49 = arith.constant 1.000000e+00 : f32
    %185 = vector.broadcast %cst_49 : f32 to vector<1x32xf32>
    %186 = arith.addf %185, %184 : vector<1x32xf32>
    %187 = arith.divf %185, %186 : vector<1x32xf32>
    %188 = vector.extract_strided_slice %181 {offsets = [0, 32], sizes = [1, 32], strides = [1, 1]} : vector<1x96xf32> to vector<1x32xf32>
    %189 = arith.negf %188 : vector<1x32xf32>
    %190 = math.exp %189 : vector<1x32xf32>
    %cst_50 = arith.constant 1.000000e+00 : f32
    %191 = vector.broadcast %cst_50 : f32 to vector<1x32xf32>
    %192 = arith.addf %191, %190 : vector<1x32xf32>
    %193 = arith.divf %191, %192 : vector<1x32xf32>
    %194 = vector.extract_strided_slice %181 {offsets = [0, 64], sizes = [1, 32], strides = [1, 1]} : vector<1x96xf32> to vector<1x32xf32>
    %195 = math.tanh %194 : vector<1x32xf32>
    %196 = arith.mulf %187, %174 : vector<1x32xf32>
    %197 = arith.mulf %193, %195 : vector<1x32xf32>
    %198 = arith.addf %196, %197 : vector<1x32xf32>
    %cst_51 = arith.constant dense<0.000000e+00> : vector<1x32xf32>
    %199 = tpu.matmul %198, %4, %cst_51 {dimension_numbers = #tpu.dot_dimension_numbers<[1], [0], [0], [1], [0, 0, 1, 1], [], []>} : vector<1x32xf32>, vector<32x32xf32>, vector<1x32xf32> -> vector<1x32xf32>
    %200 = arith.addf %199, %5 : vector<1x32xf32>
    %cst_52 = arith.constant 0.000000e+00 : f32
    %201 = vector.broadcast %cst_52 : f32 to vector<1x32xf32>
    %202 = arith.maximumf %200, %201 : vector<1x32xf32>
    %203 = tpu.concatenate %34, %58, %82, %106, %130, %154, %178, %202 in 0 : vector<1x32xf32>, vector<1x32xf32>, vector<1x32xf32>, vector<1x32xf32>, vector<1x32xf32>, vector<1x32xf32>, vector<1x32xf32>, vector<1x32xf32> -> vector<8x32xf32>
    %c0_53 = arith.constant 0 : index
    %c0_54 = arith.constant 0 : index
    %204 = vector.load %arg6[%c0_53, %c0_54] : memref<32x96xf32, #tpu.memory_space<vmem>>, vector<32x96xf32>
    %c0_55 = arith.constant 0 : index
    %c0_56 = arith.constant 0 : index
    %205 = vector.load %arg7[%c0_55, %c0_56] : memref<32x96xf32, #tpu.memory_space<vmem>>, vector<32x96xf32>
    %c0_57 = arith.constant 0 : index
    %c0_58 = arith.constant 0 : index
    %206 = vector.load %arg8[%c0_57, %c0_58] : memref<1x96xf32, #tpu.memory_space<vmem>>, vector<1x96xf32>
    %c0_59 = arith.constant 0 : index
    %c0_60 = arith.constant 0 : index
    %207 = vector.load %arg9[%c0_59, %c0_60] : memref<32x32xf32, #tpu.memory_space<vmem>>, vector<32x32xf32>
    %c0_61 = arith.constant 0 : index
    %c0_62 = arith.constant 0 : index
    %208 = vector.load %arg10[%c0_61, %c0_62] : memref<1x32xf32, #tpu.memory_space<vmem>>, vector<1x32xf32>
    %cst_63 = arith.constant dense<0.000000e+00> : vector<8x96xf32>
    %209 = tpu.matmul %203, %204, %cst_63 {dimension_numbers = #tpu.dot_dimension_numbers<[1], [0], [0], [1], [0, 0, 1, 1], [], []>} : vector<8x32xf32>, vector<32x96xf32>, vector<8x96xf32> -> vector<8x96xf32>
    %210 = vector.broadcast %206 : vector<1x96xf32> to vector<8x96xf32>
    %211 = arith.addf %209, %210 : vector<8x96xf32>
    %cst_64 = arith.constant 0.000000e+00 : f32
    %212 = vector.broadcast %cst_64 : f32 to vector<1x32xf32>
    %cst_65 = arith.constant 0.000000e+00 : f32
    %213 = vector.broadcast %cst_65 : f32 to vector<1x32xf32>
    %214 = vector.extract_strided_slice %211 {offsets = [0, 0], sizes = [1, 96], strides = [1, 1]} : vector<8x96xf32> to vector<1x96xf32>
    %cst_66 = arith.constant dense<0.000000e+00> : vector<1x96xf32>
    %215 = tpu.matmul %212, %205, %cst_66 {dimension_numbers = #tpu.dot_dimension_numbers<[1], [0], [0], [1], [0, 0, 1, 1], [], []>} : vector<1x32xf32>, vector<32x96xf32>, vector<1x96xf32> -> vector<1x96xf32>
    %216 = arith.addf %214, %215 : vector<1x96xf32>
    %217 = vector.extract_strided_slice %216 {offsets = [0, 0], sizes = [1, 32], strides = [1, 1]} : vector<1x96xf32> to vector<1x32xf32>
    %218 = arith.negf %217 : vector<1x32xf32>
    %219 = math.exp %218 : vector<1x32xf32>
    %cst_67 = arith.constant 1.000000e+00 : f32
    %220 = vector.broadcast %cst_67 : f32 to vector<1x32xf32>
    %221 = arith.addf %220, %219 : vector<1x32xf32>
    %222 = arith.divf %220, %221 : vector<1x32xf32>
    %223 = vector.extract_strided_slice %216 {offsets = [0, 32], sizes = [1, 32], strides = [1, 1]} : vector<1x96xf32> to vector<1x32xf32>
    %224 = arith.negf %223 : vector<1x32xf32>
    %225 = math.exp %224 : vector<1x32xf32>
    %cst_68 = arith.constant 1.000000e+00 : f32
    %226 = vector.broadcast %cst_68 : f32 to vector<1x32xf32>
    %227 = arith.addf %226, %225 : vector<1x32xf32>
    %228 = arith.divf %226, %227 : vector<1x32xf32>
    %229 = vector.extract_strided_slice %216 {offsets = [0, 64], sizes = [1, 32], strides = [1, 1]} : vector<1x96xf32> to vector<1x32xf32>
    %230 = math.tanh %229 : vector<1x32xf32>
    %231 = arith.mulf %222, %213 : vector<1x32xf32>
    %232 = arith.mulf %228, %230 : vector<1x32xf32>
    %233 = arith.addf %231, %232 : vector<1x32xf32>
    %cst_69 = arith.constant dense<0.000000e+00> : vector<1x32xf32>
    %234 = tpu.matmul %233, %207, %cst_69 {dimension_numbers = #tpu.dot_dimension_numbers<[1], [0], [0], [1], [0, 0, 1, 1], [], []>} : vector<1x32xf32>, vector<32x32xf32>, vector<1x32xf32> -> vector<1x32xf32>
    %235 = arith.addf %234, %208 : vector<1x32xf32>
    %cst_70 = arith.constant 0.000000e+00 : f32
    %236 = vector.broadcast %cst_70 : f32 to vector<1x32xf32>
    %237 = arith.maximumf %235, %236 : vector<1x32xf32>
    %238 = vector.extract_strided_slice %211 {offsets = [1, 0], sizes = [1, 96], strides = [1, 1]} : vector<8x96xf32> to vector<1x96xf32>
    %cst_71 = arith.constant dense<0.000000e+00> : vector<1x96xf32>
    %239 = tpu.matmul %237, %205, %cst_71 {dimension_numbers = #tpu.dot_dimension_numbers<[1], [0], [0], [1], [0, 0, 1, 1], [], []>} : vector<1x32xf32>, vector<32x96xf32>, vector<1x96xf32> -> vector<1x96xf32>
    %240 = arith.addf %238, %239 : vector<1x96xf32>
    %241 = vector.extract_strided_slice %240 {offsets = [0, 0], sizes = [1, 32], strides = [1, 1]} : vector<1x96xf32> to vector<1x32xf32>
    %242 = arith.negf %241 : vector<1x32xf32>
    %243 = math.exp %242 : vector<1x32xf32>
    %cst_72 = arith.constant 1.000000e+00 : f32
    %244 = vector.broadcast %cst_72 : f32 to vector<1x32xf32>
    %245 = arith.addf %244, %243 : vector<1x32xf32>
    %246 = arith.divf %244, %245 : vector<1x32xf32>
    %247 = vector.extract_strided_slice %240 {offsets = [0, 32], sizes = [1, 32], strides = [1, 1]} : vector<1x96xf32> to vector<1x32xf32>
    %248 = arith.negf %247 : vector<1x32xf32>
    %249 = math.exp %248 : vector<1x32xf32>
    %cst_73 = arith.constant 1.000000e+00 : f32
    %250 = vector.broadcast %cst_73 : f32 to vector<1x32xf32>
    %251 = arith.addf %250, %249 : vector<1x32xf32>
    %252 = arith.divf %250, %251 : vector<1x32xf32>
    %253 = vector.extract_strided_slice %240 {offsets = [0, 64], sizes = [1, 32], strides = [1, 1]} : vector<1x96xf32> to vector<1x32xf32>
    %254 = math.tanh %253 : vector<1x32xf32>
    %255 = arith.mulf %246, %233 : vector<1x32xf32>
    %256 = arith.mulf %252, %254 : vector<1x32xf32>
    %257 = arith.addf %255, %256 : vector<1x32xf32>
    %cst_74 = arith.constant dense<0.000000e+00> : vector<1x32xf32>
    %258 = tpu.matmul %257, %207, %cst_74 {dimension_numbers = #tpu.dot_dimension_numbers<[1], [0], [0], [1], [0, 0, 1, 1], [], []>} : vector<1x32xf32>, vector<32x32xf32>, vector<1x32xf32> -> vector<1x32xf32>
    %259 = arith.addf %258, %208 : vector<1x32xf32>
    %cst_75 = arith.constant 0.000000e+00 : f32
    %260 = vector.broadcast %cst_75 : f32 to vector<1x32xf32>
    %261 = arith.maximumf %259, %260 : vector<1x32xf32>
    %262 = vector.extract_strided_slice %211 {offsets = [2, 0], sizes = [1, 96], strides = [1, 1]} : vector<8x96xf32> to vector<1x96xf32>
    %cst_76 = arith.constant dense<0.000000e+00> : vector<1x96xf32>
    %263 = tpu.matmul %261, %205, %cst_76 {dimension_numbers = #tpu.dot_dimension_numbers<[1], [0], [0], [1], [0, 0, 1, 1], [], []>} : vector<1x32xf32>, vector<32x96xf32>, vector<1x96xf32> -> vector<1x96xf32>
    %264 = arith.addf %262, %263 : vector<1x96xf32>
    %265 = vector.extract_strided_slice %264 {offsets = [0, 0], sizes = [1, 32], strides = [1, 1]} : vector<1x96xf32> to vector<1x32xf32>
    %266 = arith.negf %265 : vector<1x32xf32>
    %267 = math.exp %266 : vector<1x32xf32>
    %cst_77 = arith.constant 1.000000e+00 : f32
    %268 = vector.broadcast %cst_77 : f32 to vector<1x32xf32>
    %269 = arith.addf %268, %267 : vector<1x32xf32>
    %270 = arith.divf %268, %269 : vector<1x32xf32>
    %271 = vector.extract_strided_slice %264 {offsets = [0, 32], sizes = [1, 32], strides = [1, 1]} : vector<1x96xf32> to vector<1x32xf32>
    %272 = arith.negf %271 : vector<1x32xf32>
    %273 = math.exp %272 : vector<1x32xf32>
    %cst_78 = arith.constant 1.000000e+00 : f32
    %274 = vector.broadcast %cst_78 : f32 to vector<1x32xf32>
    %275 = arith.addf %274, %273 : vector<1x32xf32>
    %276 = arith.divf %274, %275 : vector<1x32xf32>
    %277 = vector.extract_strided_slice %264 {offsets = [0, 64], sizes = [1, 32], strides = [1, 1]} : vector<1x96xf32> to vector<1x32xf32>
    %278 = math.tanh %277 : vector<1x32xf32>
    %279 = arith.mulf %270, %257 : vector<1x32xf32>
    %280 = arith.mulf %276, %278 : vector<1x32xf32>
    %281 = arith.addf %279, %280 : vector<1x32xf32>
    %cst_79 = arith.constant dense<0.000000e+00> : vector<1x32xf32>
    %282 = tpu.matmul %281, %207, %cst_79 {dimension_numbers = #tpu.dot_dimension_numbers<[1], [0], [0], [1], [0, 0, 1, 1], [], []>} : vector<1x32xf32>, vector<32x32xf32>, vector<1x32xf32> -> vector<1x32xf32>
    %283 = arith.addf %282, %208 : vector<1x32xf32>
    %cst_80 = arith.constant 0.000000e+00 : f32
    %284 = vector.broadcast %cst_80 : f32 to vector<1x32xf32>
    %285 = arith.maximumf %283, %284 : vector<1x32xf32>
    %286 = vector.extract_strided_slice %211 {offsets = [3, 0], sizes = [1, 96], strides = [1, 1]} : vector<8x96xf32> to vector<1x96xf32>
    %cst_81 = arith.constant dense<0.000000e+00> : vector<1x96xf32>
    %287 = tpu.matmul %285, %205, %cst_81 {dimension_numbers = #tpu.dot_dimension_numbers<[1], [0], [0], [1], [0, 0, 1, 1], [], []>} : vector<1x32xf32>, vector<32x96xf32>, vector<1x96xf32> -> vector<1x96xf32>
    %288 = arith.addf %286, %287 : vector<1x96xf32>
    %289 = vector.extract_strided_slice %288 {offsets = [0, 0], sizes = [1, 32], strides = [1, 1]} : vector<1x96xf32> to vector<1x32xf32>
    %290 = arith.negf %289 : vector<1x32xf32>
    %291 = math.exp %290 : vector<1x32xf32>
    %cst_82 = arith.constant 1.000000e+00 : f32
    %292 = vector.broadcast %cst_82 : f32 to vector<1x32xf32>
    %293 = arith.addf %292, %291 : vector<1x32xf32>
    %294 = arith.divf %292, %293 : vector<1x32xf32>
    %295 = vector.extract_strided_slice %288 {offsets = [0, 32], sizes = [1, 32], strides = [1, 1]} : vector<1x96xf32> to vector<1x32xf32>
    %296 = arith.negf %295 : vector<1x32xf32>
    %297 = math.exp %296 : vector<1x32xf32>
    %cst_83 = arith.constant 1.000000e+00 : f32
    %298 = vector.broadcast %cst_83 : f32 to vector<1x32xf32>
    %299 = arith.addf %298, %297 : vector<1x32xf32>
    %300 = arith.divf %298, %299 : vector<1x32xf32>
    %301 = vector.extract_strided_slice %288 {offsets = [0, 64], sizes = [1, 32], strides = [1, 1]} : vector<1x96xf32> to vector<1x32xf32>
    %302 = math.tanh %301 : vector<1x32xf32>
    %303 = arith.mulf %294, %281 : vector<1x32xf32>
    %304 = arith.mulf %300, %302 : vector<1x32xf32>
    %305 = arith.addf %303, %304 : vector<1x32xf32>
    %cst_84 = arith.constant dense<0.000000e+00> : vector<1x32xf32>
    %306 = tpu.matmul %305, %207, %cst_84 {dimension_numbers = #tpu.dot_dimension_numbers<[1], [0], [0], [1], [0, 0, 1, 1], [], []>} : vector<1x32xf32>, vector<32x32xf32>, vector<1x32xf32> -> vector<1x32xf32>
    %307 = arith.addf %306, %208 : vector<1x32xf32>
    %cst_85 = arith.constant 0.000000e+00 : f32
    %308 = vector.broadcast %cst_85 : f32 to vector<1x32xf32>
    %309 = arith.maximumf %307, %308 : vector<1x32xf32>
    %310 = vector.extract_strided_slice %211 {offsets = [4, 0], sizes = [1, 96], strides = [1, 1]} : vector<8x96xf32> to vector<1x96xf32>
    %cst_86 = arith.constant dense<0.000000e+00> : vector<1x96xf32>
    %311 = tpu.matmul %309, %205, %cst_86 {dimension_numbers = #tpu.dot_dimension_numbers<[1], [0], [0], [1], [0, 0, 1, 1], [], []>} : vector<1x32xf32>, vector<32x96xf32>, vector<1x96xf32> -> vector<1x96xf32>
    %312 = arith.addf %310, %311 : vector<1x96xf32>
    %313 = vector.extract_strided_slice %312 {offsets = [0, 0], sizes = [1, 32], strides = [1, 1]} : vector<1x96xf32> to vector<1x32xf32>
    %314 = arith.negf %313 : vector<1x32xf32>
    %315 = math.exp %314 : vector<1x32xf32>
    %cst_87 = arith.constant 1.000000e+00 : f32
    %316 = vector.broadcast %cst_87 : f32 to vector<1x32xf32>
    %317 = arith.addf %316, %315 : vector<1x32xf32>
    %318 = arith.divf %316, %317 : vector<1x32xf32>
    %319 = vector.extract_strided_slice %312 {offsets = [0, 32], sizes = [1, 32], strides = [1, 1]} : vector<1x96xf32> to vector<1x32xf32>
    %320 = arith.negf %319 : vector<1x32xf32>
    %321 = math.exp %320 : vector<1x32xf32>
    %cst_88 = arith.constant 1.000000e+00 : f32
    %322 = vector.broadcast %cst_88 : f32 to vector<1x32xf32>
    %323 = arith.addf %322, %321 : vector<1x32xf32>
    %324 = arith.divf %322, %323 : vector<1x32xf32>
    %325 = vector.extract_strided_slice %312 {offsets = [0, 64], sizes = [1, 32], strides = [1, 1]} : vector<1x96xf32> to vector<1x32xf32>
    %326 = math.tanh %325 : vector<1x32xf32>
    %327 = arith.mulf %318, %305 : vector<1x32xf32>
    %328 = arith.mulf %324, %326 : vector<1x32xf32>
    %329 = arith.addf %327, %328 : vector<1x32xf32>
    %cst_89 = arith.constant dense<0.000000e+00> : vector<1x32xf32>
    %330 = tpu.matmul %329, %207, %cst_89 {dimension_numbers = #tpu.dot_dimension_numbers<[1], [0], [0], [1], [0, 0, 1, 1], [], []>} : vector<1x32xf32>, vector<32x32xf32>, vector<1x32xf32> -> vector<1x32xf32>
    %331 = arith.addf %330, %208 : vector<1x32xf32>
    %cst_90 = arith.constant 0.000000e+00 : f32
    %332 = vector.broadcast %cst_90 : f32 to vector<1x32xf32>
    %333 = arith.maximumf %331, %332 : vector<1x32xf32>
    %334 = vector.extract_strided_slice %211 {offsets = [5, 0], sizes = [1, 96], strides = [1, 1]} : vector<8x96xf32> to vector<1x96xf32>
    %cst_91 = arith.constant dense<0.000000e+00> : vector<1x96xf32>
    %335 = tpu.matmul %333, %205, %cst_91 {dimension_numbers = #tpu.dot_dimension_numbers<[1], [0], [0], [1], [0, 0, 1, 1], [], []>} : vector<1x32xf32>, vector<32x96xf32>, vector<1x96xf32> -> vector<1x96xf32>
    %336 = arith.addf %334, %335 : vector<1x96xf32>
    %337 = vector.extract_strided_slice %336 {offsets = [0, 0], sizes = [1, 32], strides = [1, 1]} : vector<1x96xf32> to vector<1x32xf32>
    %338 = arith.negf %337 : vector<1x32xf32>
    %339 = math.exp %338 : vector<1x32xf32>
    %cst_92 = arith.constant 1.000000e+00 : f32
    %340 = vector.broadcast %cst_92 : f32 to vector<1x32xf32>
    %341 = arith.addf %340, %339 : vector<1x32xf32>
    %342 = arith.divf %340, %341 : vector<1x32xf32>
    %343 = vector.extract_strided_slice %336 {offsets = [0, 32], sizes = [1, 32], strides = [1, 1]} : vector<1x96xf32> to vector<1x32xf32>
    %344 = arith.negf %343 : vector<1x32xf32>
    %345 = math.exp %344 : vector<1x32xf32>
    %cst_93 = arith.constant 1.000000e+00 : f32
    %346 = vector.broadcast %cst_93 : f32 to vector<1x32xf32>
    %347 = arith.addf %346, %345 : vector<1x32xf32>
    %348 = arith.divf %346, %347 : vector<1x32xf32>
    %349 = vector.extract_strided_slice %336 {offsets = [0, 64], sizes = [1, 32], strides = [1, 1]} : vector<1x96xf32> to vector<1x32xf32>
    %350 = math.tanh %349 : vector<1x32xf32>
    %351 = arith.mulf %342, %329 : vector<1x32xf32>
    %352 = arith.mulf %348, %350 : vector<1x32xf32>
    %353 = arith.addf %351, %352 : vector<1x32xf32>
    %cst_94 = arith.constant dense<0.000000e+00> : vector<1x32xf32>
    %354 = tpu.matmul %353, %207, %cst_94 {dimension_numbers = #tpu.dot_dimension_numbers<[1], [0], [0], [1], [0, 0, 1, 1], [], []>} : vector<1x32xf32>, vector<32x32xf32>, vector<1x32xf32> -> vector<1x32xf32>
    %355 = arith.addf %354, %208 : vector<1x32xf32>
    %cst_95 = arith.constant 0.000000e+00 : f32
    %356 = vector.broadcast %cst_95 : f32 to vector<1x32xf32>
    %357 = arith.maximumf %355, %356 : vector<1x32xf32>
    %358 = vector.extract_strided_slice %211 {offsets = [6, 0], sizes = [1, 96], strides = [1, 1]} : vector<8x96xf32> to vector<1x96xf32>
    %cst_96 = arith.constant dense<0.000000e+00> : vector<1x96xf32>
    %359 = tpu.matmul %357, %205, %cst_96 {dimension_numbers = #tpu.dot_dimension_numbers<[1], [0], [0], [1], [0, 0, 1, 1], [], []>} : vector<1x32xf32>, vector<32x96xf32>, vector<1x96xf32> -> vector<1x96xf32>
    %360 = arith.addf %358, %359 : vector<1x96xf32>
    %361 = vector.extract_strided_slice %360 {offsets = [0, 0], sizes = [1, 32], strides = [1, 1]} : vector<1x96xf32> to vector<1x32xf32>
    %362 = arith.negf %361 : vector<1x32xf32>
    %363 = math.exp %362 : vector<1x32xf32>
    %cst_97 = arith.constant 1.000000e+00 : f32
    %364 = vector.broadcast %cst_97 : f32 to vector<1x32xf32>
    %365 = arith.addf %364, %363 : vector<1x32xf32>
    %366 = arith.divf %364, %365 : vector<1x32xf32>
    %367 = vector.extract_strided_slice %360 {offsets = [0, 32], sizes = [1, 32], strides = [1, 1]} : vector<1x96xf32> to vector<1x32xf32>
    %368 = arith.negf %367 : vector<1x32xf32>
    %369 = math.exp %368 : vector<1x32xf32>
    %cst_98 = arith.constant 1.000000e+00 : f32
    %370 = vector.broadcast %cst_98 : f32 to vector<1x32xf32>
    %371 = arith.addf %370, %369 : vector<1x32xf32>
    %372 = arith.divf %370, %371 : vector<1x32xf32>
    %373 = vector.extract_strided_slice %360 {offsets = [0, 64], sizes = [1, 32], strides = [1, 1]} : vector<1x96xf32> to vector<1x32xf32>
    %374 = math.tanh %373 : vector<1x32xf32>
    %375 = arith.mulf %366, %353 : vector<1x32xf32>
    %376 = arith.mulf %372, %374 : vector<1x32xf32>
    %377 = arith.addf %375, %376 : vector<1x32xf32>
    %cst_99 = arith.constant dense<0.000000e+00> : vector<1x32xf32>
    %378 = tpu.matmul %377, %207, %cst_99 {dimension_numbers = #tpu.dot_dimension_numbers<[1], [0], [0], [1], [0, 0, 1, 1], [], []>} : vector<1x32xf32>, vector<32x32xf32>, vector<1x32xf32> -> vector<1x32xf32>
    %379 = arith.addf %378, %208 : vector<1x32xf32>
    %cst_100 = arith.constant 0.000000e+00 : f32
    %380 = vector.broadcast %cst_100 : f32 to vector<1x32xf32>
    %381 = arith.maximumf %379, %380 : vector<1x32xf32>
    %382 = vector.extract_strided_slice %211 {offsets = [7, 0], sizes = [1, 96], strides = [1, 1]} : vector<8x96xf32> to vector<1x96xf32>
    %cst_101 = arith.constant dense<0.000000e+00> : vector<1x96xf32>
    %383 = tpu.matmul %381, %205, %cst_101 {dimension_numbers = #tpu.dot_dimension_numbers<[1], [0], [0], [1], [0, 0, 1, 1], [], []>} : vector<1x32xf32>, vector<32x96xf32>, vector<1x96xf32> -> vector<1x96xf32>
    %384 = arith.addf %382, %383 : vector<1x96xf32>
    %385 = vector.extract_strided_slice %384 {offsets = [0, 0], sizes = [1, 32], strides = [1, 1]} : vector<1x96xf32> to vector<1x32xf32>
    %386 = arith.negf %385 : vector<1x32xf32>
    %387 = math.exp %386 : vector<1x32xf32>
    %cst_102 = arith.constant 1.000000e+00 : f32
    %388 = vector.broadcast %cst_102 : f32 to vector<1x32xf32>
    %389 = arith.addf %388, %387 : vector<1x32xf32>
    %390 = arith.divf %388, %389 : vector<1x32xf32>
    %391 = vector.extract_strided_slice %384 {offsets = [0, 32], sizes = [1, 32], strides = [1, 1]} : vector<1x96xf32> to vector<1x32xf32>
    %392 = arith.negf %391 : vector<1x32xf32>
    %393 = math.exp %392 : vector<1x32xf32>
    %cst_103 = arith.constant 1.000000e+00 : f32
    %394 = vector.broadcast %cst_103 : f32 to vector<1x32xf32>
    %395 = arith.addf %394, %393 : vector<1x32xf32>
    %396 = arith.divf %394, %395 : vector<1x32xf32>
    %397 = vector.extract_strided_slice %384 {offsets = [0, 64], sizes = [1, 32], strides = [1, 1]} : vector<1x96xf32> to vector<1x32xf32>
    %398 = math.tanh %397 : vector<1x32xf32>
    %399 = arith.mulf %390, %377 : vector<1x32xf32>
    %400 = arith.mulf %396, %398 : vector<1x32xf32>
    %401 = arith.addf %399, %400 : vector<1x32xf32>
    %cst_104 = arith.constant dense<0.000000e+00> : vector<1x32xf32>
    %402 = tpu.matmul %401, %207, %cst_104 {dimension_numbers = #tpu.dot_dimension_numbers<[1], [0], [0], [1], [0, 0, 1, 1], [], []>} : vector<1x32xf32>, vector<32x32xf32>, vector<1x32xf32> -> vector<1x32xf32>
    %403 = arith.addf %402, %208 : vector<1x32xf32>
    %cst_105 = arith.constant 0.000000e+00 : f32
    %404 = vector.broadcast %cst_105 : f32 to vector<1x32xf32>
    %405 = arith.maximumf %403, %404 : vector<1x32xf32>
    %c0_106 = arith.constant 0 : index
    %c0_107 = arith.constant 0 : index
    %406 = vector.load %arg11[%c0_106, %c0_107] : memref<32x10xf32, #tpu.memory_space<vmem>>, vector<32x10xf32>
    %cst_108 = arith.constant dense<0.000000e+00> : vector<1x10xf32>
    %407 = tpu.matmul %405, %406, %cst_108 {dimension_numbers = #tpu.dot_dimension_numbers<[1], [0], [0], [1], [0, 0, 1, 1], [], []>} : vector<1x32xf32>, vector<32x10xf32>, vector<1x10xf32> -> vector<1x10xf32>
    %c0_109 = arith.constant 0 : index
    %c0_110 = arith.constant 0 : index
    %408 = vector.load %arg12[%c0_109, %c0_110] : memref<1x10xf32, #tpu.memory_space<vmem>>, vector<1x10xf32>
    %409 = arith.addf %407, %408 : vector<1x10xf32>
    %cst_111 = arith.constant dense<0xFF800000> : vector<1xf32>
    %410 = vector.multi_reduction <maximumf>, %409, %cst_111 [1] : vector<1x10xf32> to vector<1xf32>
    %411 = vector.shape_cast %410 : vector<1xf32> to vector<1x1xf32>
    %412 = vector.broadcast %411 : vector<1x1xf32> to vector<1x10xf32>
    %413 = arith.subf %409, %412 : vector<1x10xf32>
    %414 = math.exp %413 : vector<1x10xf32>
    %cst_112 = arith.constant dense<0.000000e+00> : vector<1xf32>
    %415 = vector.multi_reduction <add>, %414, %cst_112 [1] : vector<1x10xf32> to vector<1xf32>
    %416 = vector.shape_cast %415 : vector<1xf32> to vector<1x1xf32>
    %417 = math.log %416 : vector<1x1xf32>
    %418 = vector.broadcast %417 : vector<1x1xf32> to vector<1x10xf32>
    %419 = arith.subf %413, %418 : vector<1x10xf32>
    %c0_113 = arith.constant 0 : index
    %c0_114 = arith.constant 0 : index
    %420 = vector.load %arg13[%c0_113, %c0_114] : memref<1x10xf32, #tpu.memory_space<vmem>>, vector<1x10xf32>
    tpu.vector_store %arg13[%c0_113, %c0_114], %419 {strides = array<i32>} : memref<1x10xf32, #tpu.memory_space<vmem>>, vector<1x10xf32>,
    return
  }
}

</mosaic_0001>

<bundles_post_ra>
// kernel: my_lstm_forward.1
= control target key start
LH: loop header
LB: loop body
LE: loop exit
PB: predicated region body
PF: predicated region fallthrough
CT: control target
= control target key end

     0   :  { %18 = vsyncpa [#allocation3], 0  ;;  %s2372_s0 = inlined_call_operand.hbm [shape: f32[8,16], index: 0, kind: input, shape index: {}]   ;;  %s2373_s1 = inlined_call_operand.vmem [shape: f32[16,96], index: 1, kind: input, shape index: {}]   ;;  %s2374_s2 = inlined_call_operand.vmem [shape: f32[32,96], index: 2, kind: input, shape index: {}]   ;;  %s2375_s3 = inlined_call_operand.vmem [shape: f32[1,96], index: 3, kind: input, shape index: {}]   ;;  %s2376_s4 = inlined_call_operand.hbm [shape: f32[32,32], index: 4, kind: input, shape index: {}]   ;;  %s2377_s5 = inlined_call_operand.vmem [shape: f32[1,32], index: 5, kind: input, shape index: {}]   ;;  %s2378_s6 = inlined_call_operand.hbm [shape: f32[32,96], index: 6, kind: input, shape index: {}]   ;;  %s2379_s7 = inlined_call_operand.hbm [shape: f32[32,96], index: 7, kind: input, shape index: {}]   ;;  %s2380_s8 = inlined_call_operand.vmem [shape: f32[1,96], index: 8, kind: input, shape index: {}]   ;;  %s2381_s9 = inlined_call_operand.hbm [shape: f32[32,32], index: 9, kind: input, shape index: {}]   ;;  %s2382_s10 = inlined_call_operand.vmem [shape: f32[1,32], index: 10, kind: input, shape index: {}]   ;;  %s2383_s11 = inlined_call_operand.vmem [shape: f32[32,10], index: 11, kind: input, shape index: {}]   ;;  %s2384_s12 = inlined_call_operand.vmem [shape: f32[1,10], index: 12, kind: input, shape index: {}]   ;;  %s2385_s13 = inlined_call_operand.hbm [shape: f32[1,10], index: 13, kind: output, shape index: {}]  }
   0x1   :  { %19 = vsyncpa [#allocation6], 0 }
   0x2   :  { %20 = vsyncpa [#allocation9], 0  ;;  %s43_s27 = sshll.u32 %s2376_s4, 4  ;;  %s44_s27 = int_to_ptr.hbm [resolvable:$true] %s43_s27 }
   0x3   :  { %21 = vsyncpa [#allocation4], 0  ;;  %s1950_s28 = smov [#allocation5]   ;;  %s71_s15 = sshll.u32 %s2379_s7, 4  ;;  %s72_s15 = int_to_ptr.hbm [resolvable:$true] %s71_s15 }
   0x4   :  { %s45_s29 = sshll.u32 %s1950_s28, 4  ;;  %s1951_s16 = smov 128   ;;  %s46_s29 = int_to_ptr.vmem [resolvable:$true] %s45_s29 }
   0x5   :  { %s1952_s17 = smov 8   ;;  %s1953_s18 = smov [#allocation8]  }
   0x6   :  { %51 = dma.hbm_to_vmem [thread:$0]  %s44_s27, 512, %s46_s29, [#allocation6], %s1951_s16, %s1951_s16, %s1952_s17  }
   0x7   :  { %s73_s19 = sshll.u32 %s1953_s18, 4  ;;  %s27_s22 = sshll.u32 %s2372_s0, 4  ;;  %s74_s19 = int_to_ptr.vmem [resolvable:$true] %s73_s19  ;;  %s28_s22 = int_to_ptr.hbm [resolvable:$true] %s27_s22 }
   0x8   :  { %79 = dma.hbm_to_vmem [thread:$0]  %s72_s15, 512, %s74_s19, [#allocation9], %s1951_s16, %s1951_s16, %s1952_s17  }
   0x9   :  { %s58_s24 = sshll.u32 %s2378_s6, 4  ;;  %s1954_s25 = smov [#allocation2]   ;;  %s59_s24 = int_to_ptr.hbm [resolvable:$true] %s58_s24 }
   0xa   :  { %s29_s26 = sshll.u32 %s1954_s25, 4  ;;  %s1955_s7 = smov [#allocation7]   ;;  %s30_s26 = int_to_ptr.vmem [resolvable:$true] %s29_s26 }
   0xb   :  { %32 = dma.hbm_to_vmem [thread:$0]  %s28_s22, 128, %s30_s26, [#allocation3]  }
   0xc   :  { %s60_s27 = sshll.u32 %s1955_s7, 4  ;;  %s86_s30 = sshll.u32 %s2381_s9, 4  ;;  %s61_s27 = int_to_ptr.vmem [resolvable:$true] %s60_s27  ;;  %s87_s30 = int_to_ptr.hbm [resolvable:$true] %s86_s30 }
   0xd   :  { %66 = dma.hbm_to_vmem [thread:$0]  %s59_s24, 512, %s61_s27, [#allocation6], %s1951_s16, %s1951_s16, %s1952_s17  }
   0xe   :  { %s1956_s0 = smov [#allocation10]  }
   0xf   :  { %s88_s14 = sshll.u32 %s1956_s0, 4  ;;  %s89_s14 = int_to_ptr.vmem [resolvable:$true] %s88_s14 }
  0x10   :  { %94 = dma.hbm_to_vmem [thread:$0]  %s87_s30, 512, %s89_s14, [#allocation9], %s1951_s16, %s1951_s16, %s1952_s17  }
  0x11   :  { %1942 = dma.done.wait [#allocation3], 128  }
  0x12   :  { %1943 = vsyncadd [#allocation3], 4294967168 }
  0x13   :  { %1944 = dma.done.wait [#allocation6], 1024  }
  0x14   :  { %1945 = vsyncadd [#allocation6], 4294966272 }
  0x15   :  { %1946 = dma.done.wait [#allocation9], 1024  }
  0x16   :  { %1947 = vsyncadd [#allocation9], 4294966272  ;;  %v2048_v0 = vld [vmem:[%s2374_s2 + $0x18] sm:$0xff]  ;;  %v123_v1 = vld [vmem:[%s2373_s1 + $0x8] sm:$0xff]  ;;  %vm137_vm0 = vcmask 130048   ;;  %v1957_v7 = vmov 0.0  }
  0x17   :  { %v2056_v2 = vld [vmem:[%s2374_s2 + $0x10] sm:$0xff]  ;;  %177 = vmatpush.msra.mxu1 %v2048_v0  ;;  %155 = vmatpush.msra.mxu0 %v123_v1  ;;  %v122_v3 = vld [vmem:[%s2373_s1] sm:$0xff]  ;;  %v2065_v5 = vld [vmem:[%s2374_s2 + $0x8] sm:$0xff]  ;;  %s1958_s24 = smov 96   ;;  %vm161_vm5 = vcmask 261120   ;;  %vm851_vm14 = vcmask 1040384  }
  0x18   :  { %v121_v4 = vld [vmem:[#allocation2] sm:$0xff]  ;;  %256 = vmatpush.msra.mxu3 %v2048_v0  ;;  %v2101_v18 = vld [vmem:[#allocation5 + $0x10] sm:$0xff]  ;;  %v2105_v19 = vld [vmem:[#allocation5 + $0x8] sm:$0xff]  ;;  %vm853_vm15 = vcmask 1041408   ;;  %s1625_s20 = sshll.u32 %s2385_s13, 4  ;;  %s1626_s20 = int_to_ptr.hbm [resolvable:$true] %s1625_s20 }
  0x19   :  { %178 = vmatpush.msra.mxu1 %v2056_v2  ;;  %156 = vmatpush.msra.mxu0 %v122_v3  ;;  %v2072_v6 = vld [vmem:[%s2374_s2] sm:$0xff]  ;;  %v2112_v32 = vld [vmem:[#allocation5] sm:$0xff] }
  0x1a   :  { %1637 = vmatmul.msk.f32.vlgmr.msra.gmra.mxu0 %vm137_vm0, %v121_v4  ;;  %257 = vmatpush.msra.mxu3 %v2056_v2  ;;  %v1696_v8 = vld [vmem:[%s2375_s3] ss:$0 sm:$0xff] }
  0x1b   :  { %179 = vmatpush.msra.mxu1 %v2065_v5  ;;  %v2099_v17 = vld [vmem:[#allocation5 + $0x18] sm:$0xff] }
  0x1c   :  { %258 = vmatpush.msra.mxu3 %v2065_v5  ;;  %232 = vmatpush.msra.mxu2 %v2099_v17  ;;  %v2132_v36 = vld [vmem:[%s2377_s5] sm:$0x1] }
  0x1d   :  { %180 = vmatpush.msra.mxu1 %v2072_v6  ;;  %317 = vmatpush.msrb.mxu0 %v2099_v17 }
  0x1e   :  { %181 = vmatmul.f32.vlgmr.msra.gmra.mxu1 %v1957_v7  ;;  %259 = vmatpush.msra.mxu3 %v2072_v6 }
  0x1f   :  { %341 = vmatpush.msrb.mxu1 %v2048_v0  ;;  %233 = vmatpush.msra.mxu2 %v2101_v18 }
  0x20   :  { %426 = vmatpush.msrb.mxu3 %v2048_v0  ;;  %318 = vmatpush.msrb.mxu0 %v2101_v18 }
  0x21   :  { %342 = vmatpush.msrb.mxu1 %v2056_v2  ;;  %234 = vmatpush.msra.mxu2 %v2105_v19 }
  0x22   :  { %427 = vmatpush.msrb.mxu3 %v2056_v2  ;;  %319 = vmatpush.msrb.mxu0 %v2105_v19 }
  0x23   :  { %343 = vmatpush.msrb.mxu1 %v2065_v5  ;;  %235 = vmatpush.msra.mxu2 %v2112_v32 }
  0x24   :  { %428 = vmatpush.msrb.mxu3 %v2065_v5  ;;  %320 = vmatpush.msrb.mxu0 %v2112_v32 }
  0x25   :  { %344 = vmatpush.msrb.mxu1 %v2072_v6  ;;  %402 = vmatpush.msrb.mxu2 %v2099_v17 }
  0x26   :  { %429 = vmatpush.msrb.mxu3 %v2072_v6  ;;  %487 = vmatpush.msra.mxu0 %v2099_v17 }
  0x27   :  { %511 = vmatpush.msra.mxu1 %v2048_v0  ;;  %403 = vmatpush.msrb.mxu2 %v2101_v18 }
  0x28   :  { %488 = vmatpush.msra.mxu0 %v2101_v18 }
  0x29   :  { %512 = vmatpush.msra.mxu1 %v2056_v2  ;;  %404 = vmatpush.msrb.mxu2 %v2105_v19 }
  0x2a   :  { %489 = vmatpush.msra.mxu0 %v2105_v19 }
  0x2b   :  { %513 = vmatpush.msra.mxu1 %v2065_v5  ;;  %405 = vmatpush.msrb.mxu2 %v2112_v32 }
  0x2c   :  { %490 = vmatpush.msra.mxu0 %v2112_v32 }
  0x2d   :  { %514 = vmatpush.msra.mxu1 %v2072_v6 }
  0x97   :  { %v158_v9 = vpop.f32.mrf.mxu0 }
  0x98   :  { %v2095_v10 = vadd.f32 %v1696_v8, %v158_v9 }
  0x9b   :  { %v182_v11 = vpop.f32.mrf.mxu1 }
  0x9c   :  { %v185_v12 = vadd.f32 %v182_v11, %v2095_v10 }
  0x9e   :  { %1698 = vtanh.f32 %v185_v12  ;;  %v1638_v14 = vmul.f32 -1.442695, %v185_v12 }
  0xa0   :  { %1700 = vpow2.f32 %v1638_v14 }
  0xa4   :  { %v1699_v13 = vpop.eup %1698 }
  0xa5   :  { %208 = vrot.lane.b32.xlu0 %v1699_v13, %s1958_s24 }
  0xa6   :  { %v1701_v15 = vpop.eup %1700 }
  0xa7   :  { %v189_v16 = vadd.f32 1.0, %v1701_v15 }
  0xa9   :  { %1702 = vrcp.f32 %v189_v16  ;;  %v201_v25 = vand.u32 2147483648, %v189_v16  ;;  %vm195_vm2 = vweird.f32 %v189_v16  ;;  %v199_v26 = vand.u32 2147483647, %v189_v16 }
  0xab   :  { %v202_v28 = vor.u32 1.1754944e-38, %v201_v25  ;;  %vm200_vm4 = vcmp.eq.f32.partialorder %v199_v26, 8.507059e+37 }
  0xaf   :  { %v1703_v20 = vpop.eup %1702 }
  0xb0   :  { %v191_v21 = vmul.f32 %v1703_v20, %v189_v16  ;;  %vm196_vm1 = vweird.f32 %v1703_v20 }
  0xb1   :  { %vm197_vm3 = vmor %vm195_vm2, %vm196_vm1 }
  0xb2   :  { %v192_v22 = vsub.f32 1.0, %v191_v21 }
  0xb4   :  { %v193_v23 = vmul.f32 %v1703_v20, %v192_v22 }
  0xb6   :  { %v194_v24 = vadd.f32 %v1703_v20, %v193_v23 }
  0xb8   :  { %v198_v27 = vsel %vm197_vm3, %v1703_v20, %v194_v24 }
  0xb9   :  { %v203_v30 = vsel %vm200_vm4, %v202_v28, %v198_v27  ;;  %vm855_vm4 = vcmask 1042432  }
  0xba   :  { %v206_v33 = vmul.f32 0.0, %v203_v30 }
 0x117   :  { %v209_v29 = vpop.permute.xlu0 %208 }
 0x118   :  { %v211_v31 = vmul.f32 %v209_v29, %v203_v30 }
 0x11a   :  { %213 = vrot.lane.b32.xlu0 %v211_v31, %s1958_s24 }
 0x18c   :  { %v214_v34 = vpop.permute.xlu0 %213 }
 0x18d   :  { %v216_v35 = vadd.f32 %v214_v34, %v206_v33 }
 0x18f   :  { %1639 = vmatmul.msk.f32.vlgmr.msra.gmra.mxu2 %vm161_vm5, %v216_v35  ;;  %v288_v59 = vrot.slane %v216_v35, 7 }
 0x190   :  { %572 = vmatpush.msra.mxu2 %v2099_v17 }
 0x192   :  { %573 = vmatpush.msra.mxu2 %v2101_v18 }
 0x194   :  { %574 = vmatpush.msra.mxu2 %v2105_v19 }
 0x196   :  { %575 = vmatpush.msra.mxu2 %v2112_v32 }
 0x212   :  { %v237_v37 = vpop.f32.mrf.mxu2 }
 0x213   :  { %v2135_v38 = vadd.f32 %v237_v37, %v2132_v36 }
 0x215   :  { %v240_v39 = vmax.f32 %v2135_v38, 0.0 }
 0x217   :  { %1640 = vmatmul.msk.f32.vlgmr.msra.gmra.mxu3 %vm161_vm5, %v240_v39 }
 0x218   :  { %596 = vmatpush.msra.mxu3 %v2048_v0 }
 0x21a   :  { %597 = vmatpush.msra.mxu3 %v2056_v2 }
 0x21c   :  { %598 = vmatpush.msra.mxu3 %v2065_v5 }
 0x21e   :  { %599 = vmatpush.msra.mxu3 %v2072_v6 }
 0x29a   :  { %v261_v40 = vpop.f32.mrf.mxu3 }
 0x29b   :  { %v265_v41 = vrot.slane %v261_v40, 7 }
 0x29d   :  { %v267_v42 = vadd.f32 %v265_v41, %v2095_v10 }
 0x29f   :  { %1704 = vtanh.f32 %v267_v42  ;;  %v1641_v44 = vmul.f32 -1.442695, %v267_v42 }
 0x2a1   :  { %1706 = vpow2.f32 %v1641_v44 }
 0x2a5   :  { %v1705_v43 = vpop.eup %1704 }
 0x2a6   :  { %292 = vrot.lane.b32.xlu1 %v1705_v43, %s1958_s24 }
 0x2a7   :  { %v1707_v45 = vpop.eup %1706 }
 0x2a8   :  { %v271_v46 = vadd.f32 1.0, %v1707_v45 }
 0x2aa   :  { %1708 = vrcp.f32 %v271_v46  ;;  %v283_v52 = vand.u32 2147483648, %v271_v46  ;;  %vm277_vm7 = vweird.f32 %v271_v46  ;;  %v281_v53 = vand.u32 2147483647, %v271_v46 }
 0x2ac   :  { %v284_v55 = vor.u32 1.1754944e-38, %v283_v52  ;;  %vm282_vm9 = vcmp.eq.f32.partialorder %v281_v53, 8.507059e+37 }
 0x2b0   :  { %v1709_v47 = vpop.eup %1708 }
 0x2b1   :  { %v273_v48 = vmul.f32 %v1709_v47, %v271_v46  ;;  %vm278_vm6 = vweird.f32 %v1709_v47 }
 0x2b2   :  { %vm279_vm8 = vmor %vm277_vm7, %vm278_vm6 }
 0x2b3   :  { %v274_v49 = vsub.f32 1.0, %v273_v48 }
 0x2b5   :  { %v275_v50 = vmul.f32 %v1709_v47, %v274_v49 }
 0x2b7   :  { %v276_v51 = vadd.f32 %v1709_v47, %v275_v50 }
 0x2b9   :  { %v280_v54 = vsel %vm279_vm8, %v1709_v47, %v276_v51 }
 0x2ba   :  { %v285_v57 = vsel %vm282_vm9, %v284_v55, %v280_v54 }
 0x2bb   :  { %v290_v60 = vmul.f32 %v288_v59, %v285_v57 }
 0x318   :  { %v293_v56 = vpop.permute.xlu1 %292 }
 0x319   :  { %v295_v58 = vmul.f32 %v293_v56, %v285_v57 }
 0x31b   :  { %297 = vrot.lane.b32.xlu1 %v295_v58, %s1958_s24 }
 0x38d   :  { %v298_v61 = vpop.permute.xlu1 %297 }
 0x38e   :  { %v300_v62 = vadd.f32 %v298_v61, %v290_v60 }
 0x390   :  { %v302_v63 = vrot.slane %v300_v62, 1  ;;  %v373_v31 = vrot.slane %v300_v62, 7 }
 0x392   :  { %1642 = vmatmul.msk.f32.vlgmr.msrb.gmra.mxu0 %vm161_vm5, %v302_v63 }
 0x393   :  { %657 = vmatpush.msrb.mxu0 %v2099_v17 }
 0x395   :  { %658 = vmatpush.msrb.mxu0 %v2101_v18 }
 0x397   :  { %659 = vmatpush.msrb.mxu0 %v2105_v19 }
 0x399   :  { %660 = vmatpush.msrb.mxu0 %v2112_v32 }
 0x40f   :  { %v322_v1 = vpop.f32.mrf.mxu0 }
 0x410   :  { %v323_v3 = vadd.f32 %v322_v1, %v2132_v36 }
 0x412   :  { %v325_v4 = vmax.f32 %v323_v3, 0.0 }
 0x414   :  { %1643 = vmatmul.msk.f32.vlgmr.msrb.gmra.mxu1 %vm161_vm5, %v325_v4  ;;  %v836_v42 = vrot.slane %v325_v4, 7 }
 0x415   :  { %681 = vmatpush.msrb.mxu1 %v2048_v0 }
 0x416   :  { %v852_v45 = vsel %vm851_vm14, %v240_v39, %v836_v42 }
 0x417   :  { %682 = vmatpush.msrb.mxu1 %v2056_v2 }
 0x419   :  { %683 = vmatpush.msrb.mxu1 %v2065_v5 }
 0x41b   :  { %684 = vmatpush.msrb.mxu1 %v2072_v6 }
 0x491   :  { %v346_v8 = vpop.f32.mrf.mxu1 }
 0x492   :  { %v350_v9 = vrot.slane %v346_v8, 6 }
 0x494   :  { %v352_v11 = vadd.f32 %v350_v9, %v2095_v10 }
 0x496   :  { %1710 = vtanh.f32 %v352_v11  ;;  %v1644_v13 = vmul.f32 -1.442695, %v352_v11 }
 0x498   :  { %1712 = vpow2.f32 %v1644_v13 }
 0x49c   :  { %v1711_v12 = vpop.eup %1710 }
 0x49d   :  { %377 = vrot.lane.b32.xlu2 %v1711_v12, %s1958_s24 }
 0x49e   :  { %v1713_v14 = vpop.eup %1712 }
 0x49f   :  { %v356_v15 = vadd.f32 1.0, %v1713_v14 }
 0x4a1   :  { %1714 = vrcp.f32 %v356_v15  ;;  %v368_v24 = vand.u32 2147483648, %v356_v15  ;;  %vm362_vm11 = vweird.f32 %v356_v15  ;;  %v366_v25 = vand.u32 2147483647, %v356_v15 }
 0x4a3   :  { %v369_v27 = vor.u32 1.1754944e-38, %v368_v24  ;;  %vm367_vm13 = vcmp.eq.f32.partialorder %v366_v25, 8.507059e+37 }
 0x4a7   :  { %v1715_v16 = vpop.eup %1714 }
 0x4a8   :  { %v358_v20 = vmul.f32 %v1715_v16, %v356_v15  ;;  %vm363_vm10 = vweird.f32 %v1715_v16 }
 0x4a9   :  { %vm364_vm12 = vmor %vm362_vm11, %vm363_vm10  ;;  %vm857_vm10 = vcmask 1043456  }
 0x4aa   :  { %v359_v21 = vsub.f32 1.0, %v358_v20 }
 0x4ac   :  { %v360_v22 = vmul.f32 %v1715_v16, %v359_v21 }
 0x4ae   :  { %v361_v23 = vadd.f32 %v1715_v16, %v360_v22 }
 0x4b0   :  { %v365_v26 = vsel %vm364_vm12, %v1715_v16, %v361_v23 }
 0x4b1   :  { %v370_v29 = vsel %vm367_vm13, %v369_v27, %v365_v26 }
 0x4b2   :  { %v375_v33 = vmul.f32 %v373_v31, %v370_v29 }
 0x4f7   :  { %v378_v28 = vpop.permute.xlu2 %377 }
 0x4f8   :  { %v380_v30 = vmul.f32 %v378_v28, %v370_v29 }
 0x4fa   :  { %382 = vrot.lane.b32.xlu2 %v380_v30, %s1958_s24 }
 0x554   :  { %v383_v34 = vpop.permute.xlu2 %382 }
 0x555   :  { %v385_v35 = vadd.f32 %v383_v34, %v375_v33 }
 0x557   :  { %v387_v37 = vrot.slane %v385_v35, 2  ;;  %v458_v60 = vrot.slane %v385_v35, 7 }
 0x559   :  { %1645 = vmatmul.msk.f32.vlgmr.msrb.gmra.mxu2 %vm161_vm5, %v387_v37 }
 0x55a   :  { %742 = vmatpush.msrb.mxu2 %v2099_v17 }
 0x55c   :  { %743 = vmatpush.msrb.mxu2 %v2101_v18 }
 0x55e   :  { %744 = vmatpush.msrb.mxu2 %v2105_v19 }
 0x560   :  { %745 = vmatpush.msrb.mxu2 %v2112_v32 }
 0x5dc   :  { %v407_v40 = vpop.f32.mrf.mxu2 }
 0x5dd   :  { %v408_v41 = vadd.f32 %v407_v40, %v2132_v36 }
 0x5df   :  { %v410_v43 = vmax.f32 %v408_v41, 0.0 }
 0x5e1   :  { %v838_v44 = vrot.slane %v410_v43, 6  ;;  %1646 = vmatmul.msk.f32.vlgmr.msrb.gmra.mxu3 %vm161_vm5, %v410_v43 }
 0x5e2   :  { %766 = vmatpush.msrb.mxu3 %v2048_v0 }
 0x5e3   :  { %v854_v46 = vsel %vm853_vm15, %v852_v45, %v838_v44  ;;  %vm859_vm15 = vcmask 1044480  }
 0x5e4   :  { %767 = vmatpush.msrb.mxu3 %v2056_v2 }
 0x5e6   :  { %768 = vmatpush.msrb.mxu3 %v2065_v5 }
 0x5e8   :  { %769 = vmatpush.msrb.mxu3 %v2072_v6 }
 0x664   :  { %v431_v47 = vpop.f32.mrf.mxu3 }
 0x665   :  { %v435_v48 = vrot.slane %v431_v47, 5 }
 0x667   :  { %v437_v49 = vadd.f32 %v435_v48, %v2095_v10 }
 0x669   :  { %1716 = vtanh.f32 %v437_v49  ;;  %v1647_v51 = vmul.f32 -1.442695, %v437_v49 }
 0x66b   :  { %1718 = vpow2.f32 %v1647_v51 }
 0x66f   :  { %v1717_v50 = vpop.eup %1716 }
 0x670   :  { %462 = vrot.lane.b32.xlu0 %v1717_v50, %s1958_s24 }
 0x671   :  { %v1719_v38 = vpop.eup %1718 }
 0x672   :  { %v441_v39 = vadd.f32 1.0, %v1719_v38 }
 0x674   :  { %1720 = vrcp.f32 %v441_v39  ;;  %v453_v6 = vand.u32 2147483648, %v441_v39  ;;  %vm447_vm1 = vweird.f32 %v441_v39  ;;  %v451_v54 = vand.u32 2147483647, %v441_v39 }
 0x676   :  { %v454_v56 = vor.u32 1.1754944e-38, %v453_v6  ;;  %vm452_vm3 = vcmp.eq.f32.partialorder %v451_v54, 8.507059e+37 }
 0x67a   :  { %v1721_v0 = vpop.eup %1720 }
 0x67b   :  { %v443_v52 = vmul.f32 %v1721_v0, %v441_v39  ;;  %vm448_vm0 = vweird.f32 %v1721_v0 }
 0x67c   :  { %vm449_vm2 = vmor %vm447_vm1, %vm448_vm0 }
 0x67d   :  { %v444_v2 = vsub.f32 1.0, %v443_v52 }
 0x67f   :  { %v445_v53 = vmul.f32 %v1721_v0, %v444_v2 }
 0x681   :  { %v446_v5 = vadd.f32 %v1721_v0, %v445_v53 }
 0x683   :  { %v450_v55 = vsel %vm449_vm2, %v1721_v0, %v446_v5 }
 0x684   :  { %v455_v58 = vsel %vm452_vm3, %v454_v56, %v450_v55 }
 0x685   :  { %v460_v61 = vmul.f32 %v458_v60, %v455_v58 }
 0x6e2   :  { %v463_v57 = vpop.permute.xlu0 %462 }
 0x6e3   :  { %v465_v59 = vmul.f32 %v463_v57, %v455_v58 }
 0x6e5   :  { %467 = vrot.lane.b32.xlu1 %v465_v59, %s1958_s24 }
 0x757   :  { %v468_v62 = vpop.permute.xlu1 %467 }
 0x758   :  { %v470_v63 = vadd.f32 %v468_v62, %v460_v61 }
 0x75a   :  { %v472_v1 = vrot.slane %v470_v63, 3  ;;  %v543_v30 = vrot.slane %v470_v63, 7 }
 0x75c   :  { %1648 = vmatmul.msk.f32.vlgmr.msra.gmra.mxu0 %vm161_vm5, %v472_v1 }
 0x75d   :  { %827 = vmatpush.msra.mxu0 %v2099_v17 }
 0x75f   :  { %828 = vmatpush.msra.mxu0 %v2101_v18 }
 0x761   :  { %829 = vmatpush.msra.mxu0 %v2105_v19 }
 0x763   :  { %830 = vmatpush.msra.mxu0 %v2112_v32 }
 0x7d9   :  { %v492_v3 = vpop.f32.mrf.mxu0 }
 0x7da   :  { %v493_v4 = vadd.f32 %v492_v3, %v2132_v36 }
 0x7dc   :  { %v495_v8 = vmax.f32 %v493_v4, 0.0 }
 0x7de   :  { %v840_v9 = vrot.slane %v495_v8, 5  ;;  %1649 = vmatmul.msk.f32.vlgmr.msra.gmra.mxu1 %vm161_vm5, %v495_v8 }
 0x7e0   :  { %v856_v11 = vsel %vm855_vm4, %v854_v46, %v840_v9  ;;  %vm861_vm4 = vcmask 1045504  }
 0x85b   :  { %v516_v12 = vpop.f32.mrf.mxu1 }
 0x85c   :  { %v520_v13 = vrot.slane %v516_v12, 4 }
 0x85e   :  { %v522_v14 = vadd.f32 %v520_v13, %v2095_v10 }
 0x860   :  { %1722 = vtanh.f32 %v522_v14  ;;  %v1650_v18 = vmul.f32 -1.442695, %v522_v14 }
 0x862   :  { %1724 = vpow2.f32 %v1650_v18 }
 0x866   :  { %v1723_v17 = vpop.eup %1722 }
 0x867   :  { %547 = vrot.lane.b32.xlu2 %v1723_v17, %s1958_s24 }
 0x868   :  { %v1725_v19 = vpop.eup %1724 }
 0x869   :  { %v526_v32 = vadd.f32 1.0, %v1725_v19 }
 0x86b   :  { %1726 = vrcp.f32 %v526_v32  ;;  %v538_v23 = vand.u32 2147483648, %v526_v32  ;;  %vm532_vm7 = vweird.f32 %v526_v32  ;;  %v536_v24 = vand.u32 2147483647, %v526_v32 }
 0x86d   :  { %v539_v26 = vor.u32 1.1754944e-38, %v538_v23  ;;  %vm537_vm9 = vcmp.eq.f32.partialorder %v536_v24, 8.507059e+37 }
 0x871   :  { %v1727_v15 = vpop.eup %1726 }
 0x872   :  { %v528_v16 = vmul.f32 %v1727_v15, %v526_v32  ;;  %vm533_vm6 = vweird.f32 %v1727_v15 }
 0x873   :  { %vm534_vm8 = vmor %vm532_vm7, %vm533_vm6 }
 0x874   :  { %v529_v20 = vsub.f32 1.0, %v528_v16 }
 0x876   :  { %v530_v21 = vmul.f32 %v1727_v15, %v529_v20 }
 0x878   :  { %v531_v22 = vadd.f32 %v1727_v15, %v530_v21 }
 0x87a   :  { %v535_v25 = vsel %vm534_vm8, %v1727_v15, %v531_v22 }
 0x87b   :  { %v540_v28 = vsel %vm537_vm9, %v539_v26, %v535_v25 }
 0x87c   :  { %v545_v31 = vmul.f32 %v543_v30, %v540_v28 }
 0x8c1   :  { %v548_v27 = vpop.permute.xlu2 %547 }
 0x8c2   :  { %v550_v29 = vmul.f32 %v548_v27, %v540_v28 }
 0x8c4   :  { %552 = vrot.lane.b32.xlu0 %v550_v29, %s1958_s24 }
 0x936   :  { %v553_v33 = vpop.permute.xlu0 %552 }
 0x937   :  { %v555_v34 = vadd.f32 %v553_v33, %v545_v31 }
 0x939   :  { %v557_v35 = vrot.slane %v555_v34, 4  ;;  %v628_v57 = vrot.slane %v555_v34, 7 }
 0x93b   :  { %1651 = vmatmul.msk.f32.vlgmr.msra.gmra.mxu2 %vm161_vm5, %v557_v35 }
 0x9be   :  { %v577_v37 = vpop.f32.mrf.mxu2 }
 0x9bf   :  { %v578_v40 = vadd.f32 %v577_v37, %v2132_v36 }
 0x9c1   :  { %v580_v41 = vmax.f32 %v578_v40, 0.0 }
 0x9c3   :  { %v842_v42 = vrot.slane %v580_v41, 4  ;;  %1652 = vmatmul.msk.f32.vlgmr.msra.gmra.mxu3 %vm161_vm5, %v580_v41 }
 0x9c5   :  { %v858_v43 = vsel %vm857_vm10, %v856_v11, %v842_v42  ;;  %vm863_vm10 = vcmask 1046528  }
 0xa46   :  { %v601_v44 = vpop.f32.mrf.mxu3 }
 0xa47   :  { %v605_v45 = vrot.slane %v601_v44, 3 }
 0xa49   :  { %v607_v46 = vadd.f32 %v605_v45, %v2095_v10 }
 0xa4b   :  { %1728 = vtanh.f32 %v607_v46  ;;  %v1653_v48 = vmul.f32 -1.442695, %v607_v46 }
 0xa4d   :  { %1730 = vpow2.f32 %v1653_v48 }
 0xa51   :  { %v1729_v47 = vpop.eup %1728 }
 0xa52   :  { %632 = vrot.lane.b32.xlu1 %v1729_v47, %s1958_s24 }
 0xa53   :  { %v1731_v49 = vpop.eup %1730 }
 0xa54   :  { %v611_v50 = vadd.f32 1.0, %v1731_v49 }
 0xa56   :  { %1732 = vrcp.f32 %v611_v50  ;;  %v623_v2 = vand.u32 2147483648, %v611_v50  ;;  %vm617_vm12 = vweird.f32 %v611_v50  ;;  %v621_v53 = vand.u32 2147483647, %v611_v50 }
 0xa58   :  { %v624_v6 = vor.u32 1.1754944e-38, %v623_v2  ;;  %vm622_vm14 = vcmp.eq.f32.partialorder %v621_v53, 8.507059e+37 }
 0xa5c   :  { %v1733_v51 = vpop.eup %1732 }
 0xa5d   :  { %v613_v38 = vmul.f32 %v1733_v51, %v611_v50  ;;  %vm618_vm11 = vweird.f32 %v1733_v51 }
 0xa5e   :  { %vm619_vm13 = vmor %vm617_vm12, %vm618_vm11 }
 0xa5f   :  { %v614_v39 = vsub.f32 1.0, %v613_v38 }
 0xa61   :  { %v615_v0 = vmul.f32 %v1733_v51, %v614_v39 }
 0xa63   :  { %v616_v52 = vadd.f32 %v1733_v51, %v615_v0 }
 0xa65   :  { %v620_v5 = vsel %vm619_vm13, %v1733_v51, %v616_v52 }
 0xa66   :  { %v625_v55 = vsel %vm622_vm14, %v624_v6, %v620_v5  ;;  %v2208_v6 = vld [vmem:[#allocation8 + $0x18] sm:$0xff] }
 0xa67   :  { %v630_v58 = vmul.f32 %v628_v57, %v625_v55  ;;  %917 = vmatpush.msra.mxu2 %v2208_v6 }
 0xac4   :  { %v633_v54 = vpop.permute.xlu1 %632 }
 0xac5   :  { %v635_v56 = vmul.f32 %v633_v54, %v625_v55  ;;  %v2210_v54 = vld [vmem:[#allocation8 + $0x10] sm:$0xff] }
 0xac6   :  { %918 = vmatpush.msra.mxu2 %v2210_v54 }
 0xac7   :  { %637 = vrot.lane.b32.xlu2 %v635_v56, %s1958_s24 }
 0xb21   :  { %v638_v59 = vpop.permute.xlu2 %637 }
 0xb22   :  { %v640_v60 = vadd.f32 %v638_v59, %v630_v58 }
 0xb24   :  { %v642_v61 = vrot.slane %v640_v60, 5  ;;  %v713_v27 = vrot.slane %v640_v60, 7  ;;  %v868_v60 = vld [vmem:[#allocation7 + $0x18] sm:$0xff] }
 0xb25   :  { %897 = vmatpush.msra.mxu1 %v868_v60 }
 0xb26   :  { %1654 = vmatmul.msk.f32.vlgmr.msrb.gmra.mxu0 %vm161_vm5, %v642_v61  ;;  %v2217_v61 = vld [vmem:[#allocation8 + $0x8] sm:$0xff] }
 0xb27   :  { %996 = vmatpush.msrb.mxu0 %v2208_v6  ;;  %919 = vmatpush.msra.mxu2 %v2217_v61 }
 0xb29   :  { %997 = vmatpush.msrb.mxu0 %v2210_v54 }
 0xb2b   :  { %998 = vmatpush.msrb.mxu0 %v2217_v61 }
 0xba3   :  { %v662_v62 = vpop.f32.mrf.mxu0 }
 0xba4   :  { %v663_v63 = vadd.f32 %v662_v62, %v2132_v36  ;;  %v867_v62 = vld [vmem:[#allocation7 + $0x10] sm:$0xff] }
 0xba5   :  { %898 = vmatpush.msra.mxu1 %v867_v62 }
 0xba6   :  { %v665_v1 = vmax.f32 %v663_v63, 0.0  ;;  %v2220_v63 = vld [vmem:[#allocation8] sm:$0xff] }
 0xba7   :  { %920 = vmatpush.msra.mxu2 %v2220_v63  ;;  %999 = vmatpush.msrb.mxu0 %v2220_v63 }
 0xba8   :  { %v844_v3 = vrot.slane %v665_v1, 3  ;;  %1655 = vmatmul.msk.f32.vlgmr.msrb.gmra.mxu1 %vm161_vm5, %v665_v1  ;;  %v866_v1 = vld [vmem:[#allocation7 + $0x8] sm:$0xff] }
 0xba9   :  { %899 = vmatpush.msra.mxu1 %v866_v1 }
 0xbaa   :  { %v860_v4 = vsel %vm859_vm15, %v858_v43, %v844_v3  ;;  %v865_v3 = vld [vmem:[#allocation7] sm:$0xff] }
 0xbab   :  { %900 = vmatpush.msra.mxu1 %v865_v3 }
 0xc25   :  { %v686_v8 = vpop.f32.mrf.mxu1 }
 0xc26   :  { %v690_v9 = vrot.slane %v686_v8, 2 }
 0xc28   :  { %v692_v11 = vadd.f32 %v690_v9, %v2095_v10 }
 0xc2a   :  { %1734 = vtanh.f32 %v692_v11  ;;  %v1656_v13 = vmul.f32 -1.442695, %v692_v11 }
 0xc2c   :  { %1736 = vpow2.f32 %v1656_v13 }
 0xc30   :  { %v1735_v12 = vpop.eup %1734 }
 0xc31   :  { %717 = vrot.lane.b32.xlu0 %v1735_v12, %s1958_s24  ;;  %v1697_v12 = vld [vmem:[%s2380_s8] ss:$0 sm:$0xff] }
 0xc32   :  { %v1737_v14 = vpop.eup %1736 }
 0xc33   :  { %v696_v17 = vadd.f32 1.0, %v1737_v14 }
 0xc35   :  { %1738 = vrcp.f32 %v696_v17  ;;  %v708_v20 = vand.u32 2147483648, %v696_v17  ;;  %vm702_vm1 = vweird.f32 %v696_v17  ;;  %v706_v21 = vand.u32 2147483647, %v696_v17 }
 0xc37   :  { %v709_v23 = vor.u32 1.1754944e-38, %v708_v20  ;;  %vm707_vm3 = vcmp.eq.f32.partialorder %v706_v21, 8.507059e+37  ;;  %v2250_v20 = vld [vmem:[#allocation10 + $0x10] sm:$0xff]  ;;  %v2254_v21 = vld [vmem:[#allocation10 + $0x8] sm:$0xff] }
 0xc3b   :  { %v1739_v18 = vpop.eup %1738 }
 0xc3c   :  { %v698_v19 = vmul.f32 %v1739_v18, %v696_v17  ;;  %vm703_vm0 = vweird.f32 %v1739_v18 }
 0xc3d   :  { %vm704_vm2 = vmor %vm702_vm1, %vm703_vm0 }
 0xc3e   :  { %v699_v32 = vsub.f32 1.0, %v698_v19 }
 0xc40   :  { %v700_v15 = vmul.f32 %v1739_v18, %v699_v32 }
 0xc42   :  { %v701_v16 = vadd.f32 %v1739_v18, %v700_v15 }
 0xc44   :  { %v705_v22 = vsel %vm704_vm2, %v1739_v18, %v701_v16  ;;  %v2248_v16 = vld [vmem:[#allocation10 + $0x18] sm:$0xff] }
 0xc45   :  { %v710_v25 = vsel %vm707_vm3, %v709_v23, %v705_v22  ;;  %972 = vmatpush.msra.mxu3 %v2248_v16  ;;  %1057 = vmatpush.msrb.mxu1 %v2248_v16 }
 0xc46   :  { %v715_v28 = vmul.f32 %v713_v27, %v710_v25 }
 0xc47   :  { %973 = vmatpush.msra.mxu3 %v2250_v20  ;;  %1058 = vmatpush.msrb.mxu1 %v2250_v20 }
 0xc49   :  { %974 = vmatpush.msra.mxu3 %v2254_v21  ;;  %1059 = vmatpush.msrb.mxu1 %v2254_v21 }
 0xca3   :  { %v718_v24 = vpop.permute.xlu0 %717 }
 0xca4   :  { %v720_v26 = vmul.f32 %v718_v24, %v710_v25 }
 0xca6   :  { %722 = vrot.lane.b32.xlu1 %v720_v26, %s1958_s24 }
 0xd18   :  { %v723_v29 = vpop.permute.xlu1 %722 }
 0xd19   :  { %v725_v30 = vadd.f32 %v723_v29, %v715_v28 }
 0xd1b   :  { %v727_v31 = vrot.slane %v725_v30, 6  ;;  %v798_v55 = vrot.slane %v725_v30, 7 }
 0xd1d   :  { %1657 = vmatmul.msk.f32.vlgmr.msrb.gmra.mxu2 %vm161_vm5, %v727_v31 }
 0xd1e   :  { %1081 = vmatpush.msrb.mxu2 %v2208_v6 }
 0xd20   :  { %1082 = vmatpush.msrb.mxu2 %v2210_v54 }
 0xd22   :  { %1083 = vmatpush.msrb.mxu2 %v2217_v61 }
 0xd24   :  { %1084 = vmatpush.msrb.mxu2 %v2220_v63 }
 0xd25   :  { %921 = vmatmul.f32.vlgmr.msra.gmra.mxu2 %v1957_v7 }
 0xd26   :  { %1251 = vmatpush.msra.mxu2 %v2208_v6 }
 0xd28   :  { %1252 = vmatpush.msra.mxu2 %v2210_v54 }
 0xd2a   :  { %1253 = vmatpush.msra.mxu2 %v2217_v61 }
 0xd2c   :  { %1254 = vmatpush.msra.mxu2 %v2220_v63 }
 0xda0   :  { %v747_v33 = vpop.f32.mrf.mxu2 }
 0xda1   :  { %v748_v34 = vadd.f32 %v747_v33, %v2132_v36 }
 0xda3   :  { %v750_v35 = vmax.f32 %v748_v34, 0.0 }
 0xda5   :  { %v846_v37 = vrot.slane %v750_v35, 2  ;;  %1658 = vmatmul.msk.f32.vlgmr.msrb.gmra.mxu3 %vm161_vm5, %v750_v35  ;;  %v2261_v35 = vld [vmem:[#allocation10] sm:$0xff] }
 0xda6   :  { %975 = vmatpush.msra.mxu3 %v2261_v35  ;;  %1060 = vmatpush.msrb.mxu1 %v2261_v35 }
 0xda7   :  { %v2203_v40 = vsel %vm861_vm4, %v860_v4, %v846_v37 }
 0xda8   :  { %v922_v14 = vpop.f32.mrf.mxu2  ;;  %1142 = vmatpush.msrb.mxu3 %v2248_v16 }
 0xdaa   :  { %1143 = vmatpush.msrb.mxu3 %v2250_v20 }
 0xdac   :  { %1144 = vmatpush.msrb.mxu3 %v2254_v21 }
 0xdae   :  { %1145 = vmatpush.msrb.mxu3 %v2261_v35 }
 0xe28   :  { %v771_v41 = vpop.f32.mrf.mxu3 }
 0xe29   :  { %v775_v42 = vrot.slane %v771_v41, 1 }
 0xe2b   :  { %v777_v43 = vadd.f32 %v775_v42, %v2095_v10  ;;  %v2281_v42 = vld [vmem:[%s2382_s10] sm:$0x1] }
 0xe2d   :  { %1740 = vtanh.f32 %v777_v43  ;;  %v1659_v45 = vmul.f32 -1.442695, %v777_v43 }
 0xe2f   :  { %1742 = vpow2.f32 %v1659_v45 }
 0xe33   :  { %v1741_v44 = vpop.eup %1740 }
 0xe34   :  { %802 = vrot.lane.b32.xlu2 %v1741_v44, %s1958_s24 }
 0xe35   :  { %v1743_v46 = vpop.eup %1742 }
 0xe36   :  { %v781_v47 = vadd.f32 1.0, %v1743_v46 }
 0xe38   :  { %1744 = vrcp.f32 %v781_v47  ;;  %v793_v39 = vand.u32 2147483648, %v781_v47  ;;  %vm787_vm7 = vweird.f32 %v781_v47  ;;  %v791_v0 = vand.u32 2147483647, %v781_v47 }
 0xe3a   :  { %v794_v52 = vor.u32 1.1754944e-38, %v793_v39  ;;  %vm792_vm9 = vcmp.eq.f32.partialorder %v791_v0, 8.507059e+37 }
 0xe3e   :  { %v1745_v48 = vpop.eup %1744 }
 0xe3f   :  { %v783_v49 = vmul.f32 %v1745_v48, %v781_v47  ;;  %vm788_vm6 = vweird.f32 %v1745_v48 }
 0xe40   :  { %vm789_vm8 = vmor %vm787_vm7, %vm788_vm6 }
 0xe41   :  { %v784_v50 = vsub.f32 1.0, %v783_v49 }
 0xe43   :  { %v785_v51 = vmul.f32 %v1745_v48, %v784_v50 }
 0xe45   :  { %v786_v38 = vadd.f32 %v1745_v48, %v785_v51 }
 0xe47   :  { %v790_v10 = vsel %vm789_vm8, %v1745_v48, %v786_v38 }
 0xe48   :  { %v795_v53 = vsel %vm792_vm9, %v794_v52, %v790_v10 }
 0xe49   :  { %v800_v56 = vmul.f32 %v798_v55, %v795_v53 }
 0xe8e   :  { %v803_v2 = vpop.permute.xlu2 %802 }
 0xe8f   :  { %v805_v5 = vmul.f32 %v803_v2, %v795_v53 }
 0xe91   :  { %807 = vrot.lane.b32.xlu0 %v805_v5, %s1958_s24 }
 0xf03   :  { %v808_v57 = vpop.permute.xlu0 %807 }
 0xf04   :  { %v810_v58 = vadd.f32 %v808_v57, %v800_v56 }
 0xf06   :  { %v812_v59 = vrot.slane %v810_v58, 7 }
 0xf08   :  { %1660 = vmatmul.msk.f32.vlgmr.msra.gmra.mxu0 %vm161_vm5, %v812_v59 }
 0xf09   :  { %1166 = vmatpush.msra.mxu0 %v2208_v6 }
 0xf0b   :  { %1167 = vmatpush.msra.mxu0 %v2210_v54 }
 0xf0d   :  { %1168 = vmatpush.msra.mxu0 %v2217_v61 }
 0xf0f   :  { %1169 = vmatpush.msra.mxu0 %v2220_v63 }
 0xf85   :  { %v832_v7 = vpop.f32.mrf.mxu0 }
 0xf86   :  { %v833_v4 = vadd.f32 %v832_v7, %v2132_v36 }
 0xf88   :  { %v835_v8 = vmax.f32 %v833_v4, 0.0 }
 0xf8a   :  { %v849_v9 = vrot.slane %v835_v8, 1 }
 0xf8c   :  { %v864_v11 = vsel %vm863_vm10, %v2203_v40, %v849_v9 }
 0xf8d   :  { %1661 = vmatmul.msk.f32.vlgmr.msra.gmra.mxu1 %vm161_vm5, %v864_v11 }
 0xf8e   :  { %1227 = vmatpush.msra.mxu1 %v2248_v16 }
 0xf90   :  { %1228 = vmatpush.msra.mxu1 %v2250_v20 }
 0xf92   :  { %1229 = vmatpush.msra.mxu1 %v2254_v21 }
 0xf94   :  { %1230 = vmatpush.msra.mxu1 %v2261_v35 }
0x100a   :  { %v902_v13 = vpop.f32.mrf.mxu1 }
0x100b   :  { %v2244_v17 = vadd.f32 %v1697_v12, %v902_v13 }
0x100d   :  { %v925_v18 = vadd.f32 %v922_v14, %v2244_v17 }
0x100f   :  { %1746 = vtanh.f32 %v925_v18  ;;  %v1662_v36 = vmul.f32 -1.442695, %v925_v18 }
0x1011   :  { %1748 = vpow2.f32 %v1662_v36 }
0x1015   :  { %v1747_v19 = vpop.eup %1746 }
0x1016   :  { %948 = vrot.lane.b32.xlu1 %v1747_v19, %s1958_s24 }
0x1017   :  { %v1749_v32 = vpop.eup %1748 }
0x1018   :  { %v929_v15 = vadd.f32 1.0, %v1749_v32 }
0x101a   :  { %1750 = vrcp.f32 %v929_v15  ;;  %v941_v27 = vand.u32 2147483648, %v929_v15  ;;  %vm935_vm12 = vweird.f32 %v929_v15  ;;  %v939_v28 = vand.u32 2147483647, %v929_v15 }
0x101c   :  { %v942_v30 = vor.u32 1.1754944e-38, %v941_v27  ;;  %vm940_vm14 = vcmp.eq.f32.partialorder %v939_v28, 8.507059e+37 }
0x1020   :  { %v1751_v22 = vpop.eup %1750 }
0x1021   :  { %v931_v23 = vmul.f32 %v1751_v22, %v929_v15  ;;  %vm936_vm11 = vweird.f32 %v1751_v22 }
0x1022   :  { %vm937_vm13 = vmor %vm935_vm12, %vm936_vm11 }
0x1023   :  { %v932_v24 = vsub.f32 1.0, %v931_v23 }
0x1025   :  { %v933_v25 = vmul.f32 %v1751_v22, %v932_v24 }
0x1027   :  { %v934_v26 = vadd.f32 %v1751_v22, %v933_v25 }
0x1029   :  { %v938_v29 = vsel %vm937_vm13, %v1751_v22, %v934_v26 }
0x102a   :  { %v943_v33 = vsel %vm940_vm14, %v942_v30, %v938_v29 }
0x102b   :  { %v946_v37 = vmul.f32 0.0, %v943_v33 }
0x1088   :  { %v949_v31 = vpop.permute.xlu1 %948 }
0x1089   :  { %v951_v34 = vmul.f32 %v949_v31, %v943_v33 }
0x108b   :  { %953 = vrot.lane.b32.xlu2 %v951_v34, %s1958_s24 }
0x10e5   :  { %v954_v40 = vpop.permute.xlu2 %953 }
0x10e6   :  { %v956_v41 = vadd.f32 %v954_v40, %v946_v37 }
0x10e8   :  { %1663 = vmatmul.msk.f32.vlgmr.msra.gmra.mxu3 %vm161_vm5, %v956_v41  ;;  %v1028_v60 = vrot.slane %v956_v41, 7 }
0x10e9   :  { %1312 = vmatpush.msra.mxu3 %v2248_v16 }
0x10eb   :  { %1313 = vmatpush.msra.mxu3 %v2250_v20 }
0x10ed   :  { %1314 = vmatpush.msra.mxu3 %v2254_v21 }
0x10ef   :  { %1315 = vmatpush.msra.mxu3 %v2261_v35 }
0x116b   :  { %v977_v43 = vpop.f32.mrf.mxu3 }
0x116c   :  { %v978_v44 = vadd.f32 %v977_v43, %v2281_v42 }
0x116e   :  { %v980_v45 = vmax.f32 %v978_v44, 0.0 }
0x1170   :  { %1664 = vmatmul.msk.f32.vlgmr.msrb.gmra.mxu0 %vm161_vm5, %v980_v45 }
0x1171   :  { %1336 = vmatpush.msrb.mxu0 %v2208_v6 }
0x1173   :  { %1337 = vmatpush.msrb.mxu0 %v2210_v54 }
0x1175   :  { %1338 = vmatpush.msrb.mxu0 %v2217_v61 }
0x1177   :  { %1339 = vmatpush.msrb.mxu0 %v2220_v63 }
0x11ed   :  { %v1001_v46 = vpop.f32.mrf.mxu0 }
0x11ee   :  { %v1005_v47 = vrot.slane %v1001_v46, 7 }
0x11f0   :  { %v1007_v48 = vadd.f32 %v1005_v47, %v2244_v17 }
0x11f2   :  { %1752 = vtanh.f32 %v1007_v48  ;;  %v1665_v50 = vmul.f32 -1.442695, %v1007_v48 }
0x11f4   :  { %1754 = vpow2.f32 %v1665_v50 }
0x11f8   :  { %v1753_v49 = vpop.eup %1752 }
0x11f9   :  { %1032 = vrot.lane.b32.xlu0 %v1753_v49, %s1958_s24 }
0x11fa   :  { %v1755_v51 = vpop.eup %1754 }
0x11fb   :  { %v1011_v38 = vadd.f32 1.0, %v1755_v51 }
0x11fd   :  { %1756 = vrcp.f32 %v1011_v38  ;;  %v1023_v53 = vand.u32 2147483648, %v1011_v38  ;;  %vm1017_vm0 = vweird.f32 %v1011_v38  ;;  %v1021_v5 = vand.u32 2147483647, %v1011_v38 }
0x11ff   :  { %v1024_v56 = vor.u32 1.1754944e-38, %v1023_v53  ;;  %vm1022_vm2 = vcmp.eq.f32.partialorder %v1021_v5, 8.507059e+37 }
0x1203   :  { %v1757_v39 = vpop.eup %1756 }
0x1204   :  { %v1013_v0 = vmul.f32 %v1757_v39, %v1011_v38  ;;  %vm1018_vm15 = vweird.f32 %v1757_v39 }
0x1205   :  { %vm1019_vm1 = vmor %vm1017_vm0, %vm1018_vm15 }
0x1206   :  { %v1014_v10 = vsub.f32 1.0, %v1013_v0 }
0x1208   :  { %v1015_v52 = vmul.f32 %v1757_v39, %v1014_v10 }
0x120a   :  { %v1016_v2 = vadd.f32 %v1757_v39, %v1015_v52 }
0x120c   :  { %v1020_v55 = vsel %vm1019_vm1, %v1757_v39, %v1016_v2 }
0x120d   :  { %v1025_v58 = vsel %vm1022_vm2, %v1024_v56, %v1020_v55 }
0x120e   :  { %v1030_v62 = vmul.f32 %v1028_v60, %v1025_v58 }
0x126b   :  { %v1033_v57 = vpop.permute.xlu0 %1032 }
0x126c   :  { %v1035_v59 = vmul.f32 %v1033_v57, %v1025_v58 }
0x126e   :  { %1037 = vrot.lane.b32.xlu1 %v1035_v59, %s1958_s24 }
0x12e0   :  { %v1038_v1 = vpop.permute.xlu1 %1037 }
0x12e1   :  { %v1040_v3 = vadd.f32 %v1038_v1, %v1030_v62 }
0x12e3   :  { %v1042_v7 = vrot.slane %v1040_v3, 1  ;;  %v1113_v33 = vrot.slane %v1040_v3, 7 }
0x12e5   :  { %1666 = vmatmul.msk.f32.vlgmr.msrb.gmra.mxu1 %vm161_vm5, %v1042_v7 }
0x12e6   :  { %1397 = vmatpush.msrb.mxu1 %v2248_v16 }
0x12e8   :  { %1398 = vmatpush.msrb.mxu1 %v2250_v20 }
0x12ea   :  { %1399 = vmatpush.msrb.mxu1 %v2254_v21 }
0x12ec   :  { %1400 = vmatpush.msrb.mxu1 %v2261_v35 }
0x1362   :  { %v1062_v4 = vpop.f32.mrf.mxu1 }
0x1363   :  { %v1063_v8 = vadd.f32 %v1062_v4, %v2281_v42 }
0x1365   :  { %v1065_v9 = vmax.f32 %v1063_v8, 0.0 }
0x1367   :  { %1667 = vmatmul.msk.f32.vlgmr.msrb.gmra.mxu2 %vm161_vm5, %v1065_v9 }
0x1368   :  { %1421 = vmatpush.msrb.mxu2 %v2208_v6 }
0x136a   :  { %1422 = vmatpush.msrb.mxu2 %v2210_v54 }
0x136c   :  { %1423 = vmatpush.msrb.mxu2 %v2217_v61 }
0x136e   :  { %1424 = vmatpush.msrb.mxu2 %v2220_v63 }
0x13ea   :  { %v1086_v11 = vpop.f32.mrf.mxu2 }
0x13eb   :  { %v1090_v12 = vrot.slane %v1086_v11, 6 }
0x13ed   :  { %v1092_v13 = vadd.f32 %v1090_v12, %v2244_v17 }
0x13ef   :  { %1758 = vtanh.f32 %v1092_v13  ;;  %v1668_v18 = vmul.f32 -1.442695, %v1092_v13 }
0x13f1   :  { %1760 = vpow2.f32 %v1668_v18 }
0x13f5   :  { %v1759_v14 = vpop.eup %1758 }
0x13f6   :  { %1117 = vrot.lane.b32.xlu2 %v1759_v14, %s1958_s24 }
0x13f7   :  { %v1761_v19 = vpop.eup %1760 }
0x13f8   :  { %v1096_v36 = vadd.f32 1.0, %v1761_v19 }
0x13fa   :  { %1762 = vrcp.f32 %v1096_v36  ;;  %v1108_v25 = vand.u32 2147483648, %v1096_v36  ;;  %vm1102_vm4 = vweird.f32 %v1096_v36  ;;  %v1106_v26 = vand.u32 2147483647, %v1096_v36 }
0x13fc   :  { %v1109_v28 = vor.u32 1.1754944e-38, %v1108_v25  ;;  %vm1107_vm7 = vcmp.eq.f32.partialorder %v1106_v26, 8.507059e+37 }
0x1400   :  { %v1763_v32 = vpop.eup %1762 }
0x1401   :  { %v1098_v15 = vmul.f32 %v1763_v32, %v1096_v36  ;;  %vm1103_vm3 = vweird.f32 %v1763_v32 }
0x1402   :  { %vm1104_vm6 = vmor %vm1102_vm4, %vm1103_vm3 }
0x1403   :  { %v1099_v22 = vsub.f32 1.0, %v1098_v15 }
0x1405   :  { %v1100_v23 = vmul.f32 %v1763_v32, %v1099_v22 }
0x1407   :  { %v1101_v24 = vadd.f32 %v1763_v32, %v1100_v23 }
0x1409   :  { %v1105_v27 = vsel %vm1104_vm6, %v1763_v32, %v1101_v24 }
0x140a   :  { %v1110_v30 = vsel %vm1107_vm7, %v1109_v28, %v1105_v27 }
0x140b   :  { %v1115_v34 = vmul.f32 %v1113_v33, %v1110_v30 }
0x1450   :  { %v1118_v29 = vpop.permute.xlu2 %1117 }
0x1451   :  { %v1120_v31 = vmul.f32 %v1118_v29, %v1110_v30 }
0x1453   :  { %1122 = vrot.lane.b32.xlu0 %v1120_v31, %s1958_s24 }
0x14c5   :  { %v1123_v37 = vpop.permute.xlu0 %1122 }
0x14c6   :  { %v1125_v40 = vadd.f32 %v1123_v37, %v1115_v34 }
0x14c8   :  { %v1127_v41 = vrot.slane %v1125_v40, 2  ;;  %v1198_v56 = vrot.slane %v1125_v40, 7 }
0x14ca   :  { %1669 = vmatmul.msk.f32.vlgmr.msrb.gmra.mxu3 %vm161_vm5, %v1127_v41 }
0x14cb   :  { %1482 = vmatpush.msrb.mxu3 %v2248_v16 }
0x14cd   :  { %1483 = vmatpush.msrb.mxu3 %v2250_v20 }
0x14cf   :  { %1484 = vmatpush.msrb.mxu3 %v2254_v21 }
0x14d1   :  { %1485 = vmatpush.msrb.mxu3 %v2261_v35 }
0x154d   :  { %v1147_v43 = vpop.f32.mrf.mxu3 }
0x154e   :  { %v1148_v44 = vadd.f32 %v1147_v43, %v2281_v42 }
0x1550   :  { %v1150_v45 = vmax.f32 %v1148_v44, 0.0 }
0x1552   :  { %1670 = vmatmul.msk.f32.vlgmr.msra.gmra.mxu0 %vm161_vm5, %v1150_v45 }
0x1553   :  { %1506 = vmatpush.msra.mxu0 %v2208_v6 }
0x1555   :  { %1507 = vmatpush.msra.mxu0 %v2210_v54 }
0x1557   :  { %1508 = vmatpush.msra.mxu0 %v2217_v61 }
0x1559   :  { %1509 = vmatpush.msra.mxu0 %v2220_v63 }
0x15cf   :  { %v1171_v46 = vpop.f32.mrf.mxu0 }
0x15d0   :  { %v1175_v47 = vrot.slane %v1171_v46, 5 }
0x15d2   :  { %v1177_v48 = vadd.f32 %v1175_v47, %v2244_v17 }
0x15d4   :  { %1764 = vtanh.f32 %v1177_v48  ;;  %v1671_v50 = vmul.f32 -1.442695, %v1177_v48 }
0x15d6   :  { %1766 = vpow2.f32 %v1671_v50 }
0x15da   :  { %v1765_v49 = vpop.eup %1764 }
0x15db   :  { %1202 = vrot.lane.b32.xlu1 %v1765_v49, %s1958_s24 }
0x15dc   :  { %v1767_v51 = vpop.eup %1766 }
0x15dd   :  { %v1181_v38 = vadd.f32 1.0, %v1767_v51 }
0x15df   :  { %1768 = vrcp.f32 %v1181_v38  ;;  %v1193_v63 = vand.u32 2147483648, %v1181_v38  ;;  %vm1187_vm9 = vweird.f32 %v1181_v38  ;;  %v1191_v10 = vand.u32 2147483647, %v1181_v38 }
0x15e1   :  { %v1194_v2 = vor.u32 1.1754944e-38, %v1193_v63  ;;  %vm1192_vm11 = vcmp.eq.f32.partialorder %v1191_v10, 8.507059e+37 }
0x15e5   :  { %v1769_v6 = vpop.eup %1768 }
0x15e6   :  { %v1183_v39 = vmul.f32 %v1769_v6, %v1181_v38  ;;  %vm1188_vm8 = vweird.f32 %v1769_v6 }
0x15e7   :  { %vm1189_vm10 = vmor %vm1187_vm9, %vm1188_vm8 }
0x15e8   :  { %v1184_v54 = vsub.f32 1.0, %v1183_v39 }
0x15ea   :  { %v1185_v0 = vmul.f32 %v1769_v6, %v1184_v54 }
0x15ec   :  { %v1186_v61 = vadd.f32 %v1769_v6, %v1185_v0 }
0x15ee   :  { %v1190_v52 = vsel %vm1189_vm10, %v1769_v6, %v1186_v61 }
0x15ef   :  { %v1195_v5 = vsel %vm1192_vm11, %v1194_v2, %v1190_v52 }
0x15f0   :  { %v1200_v57 = vmul.f32 %v1198_v56, %v1195_v5 }
0x164d   :  { %v1203_v53 = vpop.permute.xlu1 %1202 }
0x164e   :  { %v1205_v55 = vmul.f32 %v1203_v53, %v1195_v5 }
0x1650   :  { %1207 = vrot.lane.b32.xlu2 %v1205_v55, %s1958_s24 }
0x16aa   :  { %v1208_v58 = vpop.permute.xlu2 %1207 }
0x16ab   :  { %v1210_v59 = vadd.f32 %v1208_v58, %v1200_v57 }
0x16ad   :  { %v1212_v60 = vrot.slane %v1210_v59, 3  ;;  %v1283_v24 = vrot.slane %v1210_v59, 7 }
0x16af   :  { %1672 = vmatmul.msk.f32.vlgmr.msra.gmra.mxu1 %vm161_vm5, %v1212_v60 }
0x16b0   :  { %1567 = vmatpush.msra.mxu1 %v2248_v16 }
0x16b2   :  { %1568 = vmatpush.msra.mxu1 %v2250_v20 }
0x16b4   :  { %1569 = vmatpush.msra.mxu1 %v2254_v21 }
0x16b6   :  { %1570 = vmatpush.msra.mxu1 %v2261_v35 }
0x172c   :  { %v1232_v62 = vpop.f32.mrf.mxu1 }
0x172d   :  { %v1233_v1 = vadd.f32 %v1232_v62, %v2281_v42 }
0x172f   :  { %v1235_v3 = vmax.f32 %v1233_v1, 0.0 }
0x1731   :  { %1673 = vmatmul.msk.f32.vlgmr.msra.gmra.mxu2 %vm161_vm5, %v1235_v3 }
0x17b4   :  { %v1256_v7 = vpop.f32.mrf.mxu2 }
0x17b5   :  { %v1260_v4 = vrot.slane %v1256_v7, 4 }
0x17b7   :  { %v1262_v8 = vadd.f32 %v1260_v4, %v2244_v17 }
0x17b9   :  { %1770 = vtanh.f32 %v1262_v8  ;;  %v1674_v16 = vmul.f32 -1.442695, %v1262_v8 }
0x17bb   :  { %1772 = vpow2.f32 %v1674_v16 }
0x17bf   :  { %v1771_v9 = vpop.eup %1770 }
0x17c0   :  { %1287 = vrot.lane.b32.xlu0 %v1771_v9, %s1958_s24 }
0x17c1   :  { %v1773_v20 = vpop.eup %1772 }
0x17c2   :  { %v1266_v21 = vadd.f32 1.0, %v1773_v20 }
0x17c4   :  { %1774 = vrcp.f32 %v1266_v21  ;;  %v1278_v18 = vand.u32 2147483648, %v1266_v21  ;;  %vm1272_vm13 = vweird.f32 %v1266_v21  ;;  %v1276_v19 = vand.u32 2147483647, %v1266_v21 }
0x17c6   :  { %v1279_v32 = vor.u32 1.1754944e-38, %v1278_v18  ;;  %vm1277_vm15 = vcmp.eq.f32.partialorder %v1276_v19, 8.507059e+37 }
0x17ca   :  { %v1775_v35 = vpop.eup %1774 }
0x17cb   :  { %v1268_v11 = vmul.f32 %v1775_v35, %v1266_v21  ;;  %vm1273_vm12 = vweird.f32 %v1775_v35 }
0x17cc   :  { %vm1274_vm14 = vmor %vm1272_vm13, %vm1273_vm12  ;;  %vm1604_vm13 = vcmask 73728  }
0x17cd   :  { %v1269_v12 = vsub.f32 1.0, %v1268_v11 }
0x17cf   :  { %v1270_v13 = vmul.f32 %v1775_v35, %v1269_v12 }
0x17d1   :  { %v1271_v14 = vadd.f32 %v1775_v35, %v1270_v13 }
0x17d3   :  { %v1275_v36 = vsel %vm1274_vm14, %v1775_v35, %v1271_v14 }
0x17d4   :  { %v1280_v22 = vsel %vm1277_vm15, %v1279_v32, %v1275_v36 }
0x17d5   :  { %v1285_v25 = vmul.f32 %v1283_v24, %v1280_v22 }
0x1832   :  { %v1288_v15 = vpop.permute.xlu0 %1287 }
0x1833   :  { %v1290_v23 = vmul.f32 %v1288_v15, %v1280_v22 }
0x1835   :  { %1292 = vrot.lane.b32.xlu1 %v1290_v23, %s1958_s24 }
0x18a7   :  { %v1293_v26 = vpop.permute.xlu1 %1292 }
0x18a8   :  { %v1295_v27 = vadd.f32 %v1293_v26, %v1285_v25 }
0x18aa   :  { %v1297_v28 = vrot.slane %v1295_v27, 4  ;;  %v1368_v61 = vrot.slane %v1295_v27, 7 }
0x18ac   :  { %1675 = vmatmul.msk.f32.vlgmr.msra.gmra.mxu3 %vm161_vm5, %v1297_v28 }
0x192f   :  { %v1317_v29 = vpop.f32.mrf.mxu3 }
0x1930   :  { %v1318_v30 = vadd.f32 %v1317_v29, %v2281_v42 }
0x1932   :  { %v1320_v31 = vmax.f32 %v1318_v30, 0.0 }
0x1934   :  { %1676 = vmatmul.msk.f32.vlgmr.msrb.gmra.mxu0 %vm161_vm5, %v1320_v31 }
0x19b1   :  { %v1341_v33 = vpop.f32.mrf.mxu0 }
0x19b2   :  { %v1345_v34 = vrot.slane %v1341_v33, 3 }
0x19b4   :  { %v1347_v37 = vadd.f32 %v1345_v34, %v2244_v17 }
0x19b6   :  { %1776 = vtanh.f32 %v1347_v37  ;;  %v1677_v41 = vmul.f32 -1.442695, %v1347_v37 }
0x19b8   :  { %1778 = vpow2.f32 %v1677_v41 }
0x19bc   :  { %v1777_v40 = vpop.eup %1776 }
0x19bd   :  { %1372 = vrot.lane.b32.xlu2 %v1777_v40, %s1958_s24 }
0x19be   :  { %v1779_v43 = vpop.eup %1778 }
0x19bf   :  { %v1351_v44 = vadd.f32 1.0, %v1779_v43 }
0x19c1   :  { %1780 = vrcp.f32 %v1351_v44  ;;  %v1363_v50 = vand.u32 2147483648, %v1351_v44  ;;  %vm1357_vm1 = vweird.f32 %v1351_v44  ;;  %v1361_v51 = vand.u32 2147483647, %v1351_v44 }
0x19c3   :  { %v1364_v6 = vor.u32 1.1754944e-38, %v1363_v50  ;;  %vm1362_vm3 = vcmp.eq.f32.partialorder %v1361_v51, 8.507059e+37 }
0x19c7   :  { %v1781_v45 = vpop.eup %1780 }
0x19c8   :  { %v1353_v46 = vmul.f32 %v1781_v45, %v1351_v44  ;;  %vm1358_vm0 = vweird.f32 %v1781_v45 }
0x19c9   :  { %vm1359_vm2 = vmor %vm1357_vm1, %vm1358_vm0 }
0x19ca   :  { %v1354_v47 = vsub.f32 1.0, %v1353_v46 }
0x19cc   :  { %v1355_v48 = vmul.f32 %v1781_v45, %v1354_v47 }
0x19ce   :  { %v1356_v49 = vadd.f32 %v1781_v45, %v1355_v48  ;;  %v1579_v48 = vld [vmem:[%s2383_s11 + $0x18] sm:$0xff] }
0x19cf   :  { %1596 = vmatpush.msra.mxu2 %v1579_v48 }
0x19d0   :  { %v1360_v38 = vsel %vm1359_vm2, %v1781_v45, %v1356_v49  ;;  %v1578_v49 = vld [vmem:[%s2383_s11 + $0x10] sm:$0xff] }
0x19d1   :  { %v1365_v54 = vsel %vm1362_vm3, %v1364_v6, %v1360_v38  ;;  %1597 = vmatpush.msra.mxu2 %v1578_v49 }
0x19d2   :  { %v1370_v63 = vmul.f32 %v1368_v61, %v1365_v54 }
0x1a17   :  { %v1373_v39 = vpop.permute.xlu2 %1372 }
0x1a18   :  { %v1375_v0 = vmul.f32 %v1373_v39, %v1365_v54  ;;  %v1577_v54 = vld [vmem:[%s2383_s11 + $0x8] sm:$0xff] }
0x1a19   :  { %1598 = vmatpush.msra.mxu2 %v1577_v54 }
0x1a1a   :  { %1377 = vrot.lane.b32.xlu0 %v1375_v0, %s1958_s24  ;;  %v1576_v0 = vld [vmem:[%s2383_s11] sm:$0xff]  ;;  %s1959_s11 = smov [#allocation11]  }
0x1a1b   :  { %1599 = vmatpush.msra.mxu2 %v1576_v0  ;;  %s1623_s9 = sshll.u32 %s1959_s11, 4  ;;  %s1624_s9 = int_to_ptr.vmem [resolvable:$true] %s1623_s9 }
0x1a8c   :  { %v1378_v10 = vpop.permute.xlu0 %1377 }
0x1a8d   :  { %v1380_v52 = vadd.f32 %v1378_v10, %v1370_v63 }
0x1a8f   :  { %v1382_v2 = vrot.slane %v1380_v52, 5  ;;  %v1453_v14 = vrot.slane %v1380_v52, 7  ;;  %v1580_v52 = vld [vmem:[%s2384_s12] sm:$0x1] }
0x1a91   :  { %1678 = vmatmul.msk.f32.vlgmr.msrb.gmra.mxu1 %vm161_vm5, %v1382_v2 }
0x1b0e   :  { %v1402_v53 = vpop.f32.mrf.mxu1 }
0x1b0f   :  { %v1403_v5 = vadd.f32 %v1402_v53, %v2281_v42 }
0x1b11   :  { %v1405_v55 = vmax.f32 %v1403_v5, 0.0 }
0x1b13   :  { %1679 = vmatmul.msk.f32.vlgmr.msrb.gmra.mxu2 %vm161_vm5, %v1405_v55 }
0x1b96   :  { %v1426_v56 = vpop.f32.mrf.mxu2 }
0x1b97   :  { %v1430_v57 = vrot.slane %v1426_v56, 2 }
0x1b99   :  { %v1432_v58 = vadd.f32 %v1430_v57, %v2244_v17 }
0x1b9b   :  { %1782 = vtanh.f32 %v1432_v58  ;;  %v1680_v60 = vmul.f32 -1.442695, %v1432_v58 }
0x1b9d   :  { %1784 = vpow2.f32 %v1680_v60 }
0x1ba1   :  { %v1783_v59 = vpop.eup %1782 }
0x1ba2   :  { %1457 = vrot.lane.b32.xlu1 %v1783_v59, %s1958_s24 }
0x1ba3   :  { %v1785_v62 = vpop.eup %1784 }
0x1ba4   :  { %v1436_v1 = vadd.f32 1.0, %v1785_v62 }
0x1ba6   :  { %1786 = vrcp.f32 %v1436_v1  ;;  %v1448_v16 = vand.u32 2147483648, %v1436_v1  ;;  %vm1442_vm6 = vweird.f32 %v1436_v1  ;;  %v1446_v20 = vand.u32 2147483647, %v1436_v1 }
0x1ba8   :  { %v1449_v35 = vor.u32 1.1754944e-38, %v1448_v16  ;;  %vm1447_vm8 = vcmp.eq.f32.partialorder %v1446_v20, 8.507059e+37 }
0x1bac   :  { %v1787_v3 = vpop.eup %1786 }
0x1bad   :  { %v1438_v7 = vmul.f32 %v1787_v3, %v1436_v1  ;;  %vm1443_vm4 = vweird.f32 %v1787_v3 }
0x1bae   :  { %vm1444_vm7 = vmor %vm1442_vm6, %vm1443_vm4 }
0x1baf   :  { %v1439_v4 = vsub.f32 1.0, %v1438_v7 }
0x1bb1   :  { %v1440_v8 = vmul.f32 %v1787_v3, %v1439_v4 }
0x1bb3   :  { %v1441_v9 = vadd.f32 %v1787_v3, %v1440_v8 }
0x1bb5   :  { %v1445_v21 = vsel %vm1444_vm7, %v1787_v3, %v1441_v9 }
0x1bb6   :  { %v1450_v12 = vsel %vm1447_vm8, %v1449_v35, %v1445_v21 }
0x1bb7   :  { %v1455_v18 = vmul.f32 %v1453_v14, %v1450_v12 }
0x1c14   :  { %v1458_v11 = vpop.permute.xlu1 %1457 }
0x1c15   :  { %v1460_v13 = vmul.f32 %v1458_v11, %v1450_v12 }
0x1c17   :  { %1462 = vrot.lane.b32.xlu2 %v1460_v13, %s1958_s24 }
0x1c71   :  { %v1463_v19 = vpop.permute.xlu2 %1462 }
0x1c72   :  { %v1465_v36 = vadd.f32 %v1463_v19, %v1455_v18 }
0x1c74   :  { %v1467_v32 = vrot.slane %v1465_v36, 6  ;;  %v1538_v50 = vrot.slane %v1465_v36, 7 }
0x1c76   :  { %1681 = vmatmul.msk.f32.vlgmr.msrb.gmra.mxu3 %vm161_vm5, %v1467_v32 }
0x1cf9   :  { %v1487_v15 = vpop.f32.mrf.mxu3 }
0x1cfa   :  { %v1488_v22 = vadd.f32 %v1487_v15, %v2281_v42 }
0x1cfc   :  { %v1490_v23 = vmax.f32 %v1488_v22, 0.0 }
0x1cfe   :  { %1682 = vmatmul.msk.f32.vlgmr.msra.gmra.mxu0 %vm161_vm5, %v1490_v23 }
0x1d7b   :  { %v1511_v24 = vpop.f32.mrf.mxu0 }
0x1d7c   :  { %v1515_v25 = vrot.slane %v1511_v24, 1 }
0x1d7e   :  { %v1517_v26 = vadd.f32 %v1515_v25, %v2244_v17 }
0x1d80   :  { %1788 = vtanh.f32 %v1517_v26  ;;  %v1683_v28 = vmul.f32 -1.442695, %v1517_v26 }
0x1d82   :  { %1790 = vpow2.f32 %v1683_v28 }
0x1d86   :  { %v1789_v27 = vpop.eup %1788 }
0x1d87   :  { %1542 = vrot.lane.b32.xlu0 %v1789_v27, %s1958_s24 }
0x1d88   :  { %v1791_v29 = vpop.eup %1790 }
0x1d89   :  { %v1521_v30 = vadd.f32 1.0, %v1791_v29 }
0x1d8b   :  { %1792 = vrcp.f32 %v1521_v30  ;;  %v1533_v41 = vand.u32 2147483648, %v1521_v30  ;;  %vm1527_vm10 = vweird.f32 %v1521_v30  ;;  %v1531_v43 = vand.u32 2147483647, %v1521_v30 }
0x1d8d   :  { %v1534_v44 = vor.u32 1.1754944e-38, %v1533_v41  ;;  %vm1532_vm12 = vcmp.eq.f32.partialorder %v1531_v43, 8.507059e+37 }
0x1d91   :  { %v1793_v31 = vpop.eup %1792 }
0x1d92   :  { %v1523_v33 = vmul.f32 %v1793_v31, %v1521_v30  ;;  %vm1528_vm9 = vweird.f32 %v1793_v31 }
0x1d93   :  { %vm1529_vm11 = vmor %vm1527_vm10, %vm1528_vm9 }
0x1d94   :  { %v1524_v34 = vsub.f32 1.0, %v1523_v33 }
0x1d96   :  { %v1525_v37 = vmul.f32 %v1793_v31, %v1524_v34 }
0x1d98   :  { %v1526_v40 = vadd.f32 %v1793_v31, %v1525_v37 }
0x1d9a   :  { %v1530_v17 = vsel %vm1529_vm11, %v1793_v31, %v1526_v40 }
0x1d9b   :  { %v1535_v46 = vsel %vm1532_vm12, %v1534_v44, %v1530_v17 }
0x1d9c   :  { %v1540_v51 = vmul.f32 %v1538_v50, %v1535_v46 }
0x1df9   :  { %v1543_v45 = vpop.permute.xlu0 %1542 }
0x1dfa   :  { %v1545_v47 = vmul.f32 %v1543_v45, %v1535_v46 }
0x1dfc   :  { %1547 = vrot.lane.b32.xlu1 %v1545_v47, %s1958_s24 }
0x1e6e   :  { %v1548_v38 = vpop.permute.xlu1 %1547 }
0x1e6f   :  { %v1550_v6 = vadd.f32 %v1548_v38, %v1540_v51 }
0x1e71   :  { %v1552_v39 = vrot.slane %v1550_v6, 7 }
0x1e73   :  { %1684 = vmatmul.msk.f32.vlgmr.msra.gmra.mxu1 %vm161_vm5, %v1552_v39 }
0x1ef0   :  { %v1572_v61 = vpop.f32.mrf.mxu1 }
0x1ef1   :  { %v1573_v63 = vadd.f32 %v1572_v61, %v2281_v42 }
0x1ef3   :  { %v1575_v10 = vmax.f32 %v1573_v63, 0.0 }
0x1ef5   :  { %1685 = vmatmul.msk.f32.vlgmr.msra.gmra.mxu2 %vm161_vm5, %v1575_v10 }
0x1f78   :  { %v1601_v2 = vpop.f32.mrf.mxu2 }
0x1f79   :  { %v1602_v53 = vadd.f32 %v1601_v2, %v1580_v52 }
0x1f7b   :  { %v1605_v5 = vsel %vm1604_vm13, %v1602_v53, -inf }
0x1f7c   :  { %1606 = vmax.xlane.f32.xlu2 %v1605_v5 }
0x1fef   :  { %v1607_v55 = vpop.xlane.xlu2 %1606 }
0x1ff0   :  { %v1608_v56 = vsub.f32 %v1602_v53, %v1607_v55 }
0x1ff2   :  { %v1609_v57 = vmul.f32 1.442695, %v1608_v56 }
0x1ff4   :  { %1794 = vpow2.f32 %v1609_v57 }
0x1ffa   :  { %v1795_v58 = vpop.eup %1794 }
0x1ffb   :  { %v1611_v42 = vsel %vm1604_vm13, %v1795_v58, 0.0 }
0x1ffc   :  { %1612 = vadd.xlane.f32.xlu0 %v1611_v42 }
0x206f   :  { %v1613_v59 = vpop.xlane.xlu0 %1612 }
0x2070   :  { %1796 = vlog2.f32 %v1613_v59 }
0x2076   :  { %v1797_v60 = vpop.eup %1796 }
0x2077   :  { %v1615_v62 = vmul.f32 0.6931472, %v1797_v60 }
0x2079   :  { %v1616_v1 = vsub.f32 %v1608_v56, %v1615_v62 }
0x207b   :  { %1617 = vst.msk [vmem:[#allocation11] sm:$0x1] %vm1604_vm13, %v1616_v1 }
0x207c   :  { %1628 = dma.vmem_to_hbm [thread:$0]  %s1624_s9, 16, %s1626_s20, [#allocation4]  }
0x207d   :  { %1948 = dma.done.wait [#allocation4], 16  }
0x207e   :  { %1949 = vsyncadd [#allocation4], 4294967280 }
0x207f   :  { %1633 = vsyncpa [#allocation3], 1 }
0x2080   :  { %1634 = vsyncpa [#allocation6], 1 }
0x2081   :  { %1635 = vsyncpa [#allocation9], 1 }
0x2082   :  { %1636 = vsyncpa [#allocation4], 1 }

</bundles_post_ra>
